<compile_context>
chip_gen: v5e
topology: v5e:2x2
jax: 0.10.0
libtpu: 0.0.40
codegen_flags: <defaults>
</compile_context>

<pallas_src>
import functools

import jax
import jax.numpy as jnp
from jax.experimental import pallas as pl
from jax.experimental.pallas import tpu as pltpu


# ----------------------------------------------------------------------------
# Fused decoder-step kernel: L DCGRU layers + projection, one batch tile/step
# ----------------------------------------------------------------------------
def _decoder_kernel(*refs, L, K, U, TB):
    """Fused decoder step for one batch tile of TB examples.

    Ref layout (in_specs order, then out_specs):
      refs[0]            adj    (N, N)        transposed random-walk support (resident)
      refs[1]            x      (TB, N, Dout) layer-0 input tile
      refs[2]            h      (L, TB, N, U) previous hidden states tile
      refs[3+4l+0]       wx_l   (K*Din_l, 3U) fused gate(2U)+candidate(U) input weights
      refs[3+4l+1]       wgh_l  (K*U, 2U)     gate weights on the state part
      refs[3+4l+2]       wch_l  (K*U, U)      candidate weights on the state part
      refs[3+4l+3]       b3_l   (1, 3U)       fused bias [gate=1.0 | candidate=0.0]
      refs[3+4L]         w_proj (U, Dout)
      refs[4+4L]         b_proj (1, Dout)
      refs[5+4L] (out)   new_h  (L, TB, N, U)
      refs[6+4L] (out)   out    (TB, N, Dout)
    """
    adj_ref, x_ref, h_ref = refs[0], refs[1], refs[2]
    w_refs = refs[3:3 + 4 * L]
    wproj_ref, bproj_ref = refs[3 + 4 * L], refs[4 + 4 * L]
    newh_ref, out_ref = refs[5 + 4 * L], refs[6 + 4 * L]

    adj = adj_ref[...]                                # (N, N)
    N = adj.shape[0]

    def diffusion_stack(z3):
        # z3: (TB, N, D).  For each batch element: Chebyshev diffusion
        # T0 = z, T1 = A z, Tk = 2 A T_{k-1} - T_{k-2}, with the K terms
        # stacked along the feature (lane) axis, then rows re-joined over the
        # tile -> (TB*N, K*D), rows ordered (b, n), lanes ordered (k, f).
        per_b = []
        for b in range(TB):                           # static unroll over tile
            z = z3[b]                                 # (N, D)
            terms = [z]
            if K > 1:
                t1 = jnp.dot(adj, z, preferred_element_type=jnp.float32)
                terms.append(t1)
                tkm2, tkm1 = z, t1
                for _ in range(2, K):
                    tk = (2.0 * jnp.dot(adj, tkm1,
                                        preferred_element_type=jnp.float32)
                          - tkm2)
                    terms.append(tk)
                    tkm2, tkm1 = tkm1, tk
            per_b.append(terms[0] if K == 1
                         else jnp.concatenate(terms, axis=-1))     # (N, K*D)
        if TB == 1:
            return per_b[0]
        return jnp.concatenate(per_b, axis=0)         # (TB*N, K*D)

    x3 = x_ref[...]                                   # (TB, N, Din_0)
    for l in range(L):                                # static unroll over layers
        wx = w_refs[4 * l][...]                       # (K*Din, 3U)
        wgh = w_refs[4 * l + 1][...]                  # (K*U, 2U)
        wch = w_refs[4 * l + 2][...]                  # (K*U, U)
        b3 = w_refs[4 * l + 3][...]                   # (1, 3U)
        h3 = h_ref[l]                                 # (TB, N, U)
        h2 = h3.reshape(TB * N, U)

        # Shared input-side contraction for gates AND candidate: one matmul.
        tx = diffusion_stack(x3)                      # (TB*N, K*Din)
        xw = jnp.dot(tx, wx, preferred_element_type=jnp.float32) + b3  # (TB*N, 3U)

        # r / u gates (gconv output 2U, bias_start=1.0 already folded into b3).
        th = diffusion_stack(h3)                      # (TB*N, K*U)
        gate = jax.nn.sigmoid(
            xw[:, :2 * U]
            + jnp.dot(th, wgh, preferred_element_type=jnp.float32))    # (TB*N, 2U)
        r = gate[:, :U]
        u = gate[:, U:]

        # Candidate state (gconv output U, bias_start=0.0).
        trh = diffusion_stack((r * h2).reshape(TB, N, U))               # (TB*N, K*U)
        c = jnp.tanh(
            xw[:, 2 * U:]
            + jnp.dot(trh, wch, preferred_element_type=jnp.float32))    # (TB*N, U)

        newh2 = u * h2 + (1.0 - u) * c                # (TB*N, U)
        newh_ref[l] = newh2.reshape(TB, N, U)
        x3 = newh2.reshape(TB, N, U)

    # Final projection (nn.Linear(rnn_units, output_dim)) fused into same kernel.
    out2 = (jnp.dot(x3.reshape(TB * N, U), wproj_ref[...],
                    preferred_element_type=jnp.float32) + bproj_ref[...])
    out_ref[...] = out2.reshape(out_ref.shape)


# ----------------------------------------------------------------------------
# Plain-JAX glue (tiny O(N^2) adjacency preprocessing + free reshapes)
# ----------------------------------------------------------------------------
def random_walk_matrix_T(adj):
    # DCGRUCell._calculate_random_walk_matrix(adj).t() (GTS variant: A + I).
    n = adj.shape[0]
    a = adj + jnp.eye(n, dtype=adj.dtype)
    d = jnp.sum(a, axis=1)
    d_inv = 1.0 / d
    d_inv = jnp.where(jnp.isinf(d_inv), jnp.zeros_like(d_inv), d_inv)
    rw = d_inv[:, None] * a                 # diag(d_inv) @ a
    return rw.T


def init_params(key, *, rnn_units, output_dim, num_rnn_layers, K):
    U = rnn_units
    params = {'layers': []}
    din = output_dim
    for _ in range(num_rnn_layers):
        key, k1, k2, k3 = jax.random.split(key, 4)
        params['layers'].append({
            # Fused input-side weights: columns [0:2U] gate, [2U:3U] candidate.
            # Rows ordered k-major, feature-minor to match the lane stacking.
            'wx': 0.1 * jax.random.normal(k1, (K * din, 3 * U), jnp.float32),
            'wgh': 0.1 * jax.random.normal(k2, (K * U, 2 * U), jnp.float32),
            'wch': 0.1 * jax.random.normal(k3, (K * U, U), jnp.float32),
            # Fused bias: gate bias_start = 1.0, candidate bias_start = 0.0.
            'b3': jnp.concatenate([jnp.full((1, 2 * U), 1.0, jnp.float32),
                                   jnp.zeros((1, U), jnp.float32)], axis=-1),
        })
        din = U
    key, kp = jax.random.split(key)
    params['w_proj'] = 0.1 * jax.random.normal(kp, (U, output_dim), jnp.float32)
    params['b_proj'] = jnp.zeros((1, output_dim), jnp.float32)
    return params


def _pick_batch_tile(B):
    # Whole batch in one grid step when small; otherwise a divisor tile so the
    # grid pipelines batch tiles and megacore can split them across cores.
    if B <= 8:
        return B
    for cand in (8, 4, 2):
        if B % cand == 0:
            return cand
    return B


def decoder_forward(params, inputs, adj, hidden_state=None, *,
                    num_nodes, rnn_units, output_dim, K):
    """Mirrors DecoderModel.forward.

    inputs       : (B, num_nodes * output_dim)
    adj          : (num_nodes, num_nodes)
    hidden_state : (num_rnn_layers, B, num_nodes * rnn_units) or None (zeros)
    returns      : output (B, num_nodes * output_dim),
                   new hidden (num_rnn_layers, B, num_nodes * rnn_units)
    """
    B = inputs.shape[0]
    N, U, Dout = num_nodes, rnn_units, output_dim
    L = len(params['layers'])

    if hidden_state is None:
        hidden_state = jnp.zeros((L, B, N * U), jnp.float32)

    # Transposed random-walk support, kept at (N, N): no B^2 block-diag blow-up.
    adj_t = random_walk_matrix_T(adj)

    # Free (contiguous) reshapes to the kernel's (batch, node, feature) layout.
    x0 = inputs.reshape(B, N, Dout).astype(jnp.float32)
    h0 = hidden_state.reshape(L, B, N, U).astype(jnp.float32)

    TB = _pick_batch_tile(B)
    grid = (B // TB,)

    flat_w = []
    for lp in params['layers']:
        flat_w += [lp['wx'], lp['wgh'], lp['wch'], lp['b3']]

    kernel = functools.partial(_decoder_kernel, L=L, K=K, U=U, TB=TB)
    vmem_full = pl.BlockSpec(memory_space=pltpu.MemorySpace.VMEM)

    in_specs = (
        [vmem_full,                                                # adj_t (resident)
         pl.BlockSpec((TB, N, Dout), lambda i: (i, 0, 0)),         # x0 tile
         pl.BlockSpec((L, TB, N, U), lambda i: (0, i, 0, 0))]      # h0 tile
        + [vmem_full] * (4 * L + 2))                               # weights/biases

    out_specs = (
        pl.BlockSpec((L, TB, N, U), lambda i: (0, i, 0, 0)),       # new hidden
        pl.BlockSpec((TB, N, Dout), lambda i: (i, 0, 0)))          # projected out

    newh, out = pl.pallas_call(
        kernel,
        grid=grid,
        out_shape=(jax.ShapeDtypeStruct((L, B, N, U), jnp.float32),
                   jax.ShapeDtypeStruct((B, N, Dout), jnp.float32)),
        in_specs=in_specs,
        out_specs=out_specs,
        input_output_aliases={2: 0},                  # hidden state updated in place
        compiler_params=pltpu.CompilerParams(
            dimension_semantics=("parallel",)),
    )(adj_t, x0, h0, *flat_w, params['w_proj'], params['b_proj'])

    return out.reshape(B, N * Dout), newh.reshape(L, B, N * U)


# ----------------------------------------------------------------------------
if __name__ == "__main__":
    # Small configuration consistent with the module's __init__.
    batch = 2
    num_nodes = 8
    rnn_units = 32
    output_dim = 4
    num_rnn_layers = 2
    max_diffusion_step = 2
    K = max_diffusion_step + 1

    key = jax.random.PRNGKey(0)
    kparam, kx, kadj, kh = jax.random.split(key, 4)

    params = init_params(kparam, rnn_units=rnn_units, output_dim=output_dim,
                         num_rnn_layers=num_rnn_layers, K=K)

    inputs = jax.random.normal(kx, (batch, num_nodes * output_dim), jnp.float32)
    adj = jax.random.uniform(kadj, (num_nodes, num_nodes), jnp.float32)
    hidden = 0.1 * jax.random.normal(
        kh, (num_rnn_layers, batch, num_nodes * rnn_units), jnp.float32)

    fwd = jax.jit(functools.partial(decoder_forward,
                                    num_nodes=num_nodes, rnn_units=rnn_units,
                                    output_dim=output_dim, K=K))
    out, new_hidden = fwd(params, inputs, adj, hidden)
    jax.block_until_ready((out, new_hidden))

    assert out.shape == (batch, num_nodes * output_dim)
    assert new_hidden.shape == (num_rnn_layers, batch, num_nodes * rnn_units)
    assert jnp.all(jnp.isfinite(out)) and jnp.all(jnp.isfinite(new_hidden))
    print("KERNEL_OK")
</pallas_src>

<mosaic_0001>
module attributes {stable_mosaic.version = 11 : i64} {
  func.func @_decoder_kernel(%arg0: i32, %arg1: memref<8x8xf32, #tpu.memory_space<vmem>>, %arg2: memref<2x8x4xf32, #tpu.memory_space<vmem>>, %arg3: memref<2x2x8x32xf32, #tpu.memory_space<vmem>>, %arg4: memref<12x96xf32, #tpu.memory_space<vmem>>, %arg5: memref<96x64xf32, #tpu.memory_space<vmem>>, %arg6: memref<96x32xf32, #tpu.memory_space<vmem>>, %arg7: memref<1x96xf32, #tpu.memory_space<vmem>>, %arg8: memref<96x96xf32, #tpu.memory_space<vmem>>, %arg9: memref<96x64xf32, #tpu.memory_space<vmem>>, %arg10: memref<96x32xf32, #tpu.memory_space<vmem>>, %arg11: memref<1x96xf32, #tpu.memory_space<vmem>>, %arg12: memref<32x4xf32, #tpu.memory_space<vmem>>, %arg13: memref<1x4xf32, #tpu.memory_space<vmem>>, %arg14: memref<2x2x8x32xf32, #tpu.memory_space<vmem>>, %arg15: memref<2x8x4xf32, #tpu.memory_space<vmem>>) attributes {dimension_semantics = [#tpu.dimension_semantics<parallel>], iteration_bounds = array<i64: 1>, scalar_prefetch = 0 : i64, scratch_operands = 0 : i64, tpu.core_type = #tpu.core_type<tc>, window_params = [{pipeline_mode = #tpu.pipeline_mode<synchronous>, transform_indices = @transform_0, window_bounds = array<i64: 8, 8>}, {transform_indices = @transform_1, window_bounds = array<i64: 2, 8, 4>}, {transform_indices = @transform_2, window_bounds = array<i64: 2, 2, 8, 32>}, {pipeline_mode = #tpu.pipeline_mode<synchronous>, transform_indices = @transform_3, window_bounds = array<i64: 12, 96>}, {pipeline_mode = #tpu.pipeline_mode<synchronous>, transform_indices = @transform_4, window_bounds = array<i64: 96, 64>}, {pipeline_mode = #tpu.pipeline_mode<synchronous>, transform_indices = @transform_5, window_bounds = array<i64: 96, 32>}, {pipeline_mode = #tpu.pipeline_mode<synchronous>, transform_indices = @transform_6, window_bounds = array<i64: 1, 96>}, {pipeline_mode = #tpu.pipeline_mode<synchronous>, transform_indices = @transform_7, window_bounds = array<i64: 96, 96>}, {pipeline_mode = #tpu.pipeline_mode<synchronous>, transform_indices = @transform_8, window_bounds = array<i64: 96, 64>}, {pipeline_mode = #tpu.pipeline_mode<synchronous>, transform_indices = @transform_9, window_bounds = array<i64: 96, 32>}, {pipeline_mode = #tpu.pipeline_mode<synchronous>, transform_indices = @transform_10, window_bounds = array<i64: 1, 96>}, {pipeline_mode = #tpu.pipeline_mode<synchronous>, transform_indices = @transform_11, window_bounds = array<i64: 32, 4>}, {pipeline_mode = #tpu.pipeline_mode<synchronous>, transform_indices = @transform_12, window_bounds = array<i64: 1, 4>}, {transform_indices = @transform_13, window_bounds = array<i64: 2, 2, 8, 32>}, {transform_indices = @transform_14, window_bounds = array<i64: 2, 8, 4>}]} {
    %c0 = arith.constant 0 : index
    %c0_0 = arith.constant 0 : index
    %0 = vector.load %arg1[%c0, %c0_0] : memref<8x8xf32, #tpu.memory_space<vmem>>, vector<8x8xf32>
    %c0_1 = arith.constant 0 : index
    %c0_2 = arith.constant 0 : index
    %c0_3 = arith.constant 0 : index
    %1 = vector.load %arg2[%c0_1, %c0_2, %c0_3] : memref<2x8x4xf32, #tpu.memory_space<vmem>>, vector<2x8x4xf32>
    %c0_4 = arith.constant 0 : index
    %c0_5 = arith.constant 0 : index
    %2 = vector.load %arg4[%c0_4, %c0_5] : memref<12x96xf32, #tpu.memory_space<vmem>>, vector<12x96xf32>
    %c0_6 = arith.constant 0 : index
    %c0_7 = arith.constant 0 : index
    %3 = vector.load %arg5[%c0_6, %c0_7] : memref<96x64xf32, #tpu.memory_space<vmem>>, vector<96x64xf32>
    %c0_8 = arith.constant 0 : index
    %c0_9 = arith.constant 0 : index
    %4 = vector.load %arg6[%c0_8, %c0_9] : memref<96x32xf32, #tpu.memory_space<vmem>>, vector<96x32xf32>
    %c0_10 = arith.constant 0 : index
    %c0_11 = arith.constant 0 : index
    %5 = vector.load %arg7[%c0_10, %c0_11] : memref<1x96xf32, #tpu.memory_space<vmem>>, vector<1x96xf32>
    %c0_12 = arith.constant 0 : index
    %c0_13 = arith.constant 0 : index
    %c0_14 = arith.constant 0 : index
    %c0_15 = arith.constant 0 : index
    %6 = vector.load %arg3[%c0_12, %c0_13, %c0_14, %c0_15] : memref<2x2x8x32xf32, #tpu.memory_space<vmem>>, vector<1x2x8x32xf32>
    %7 = vector.shape_cast %6 : vector<1x2x8x32xf32> to vector<2x8x32xf32>
    %8 = vector.shape_cast %7 : vector<2x8x32xf32> to vector<16x32xf32>
    %9 = vector.extract_strided_slice %1 {offsets = [0, 0, 0], sizes = [1, 8, 4], strides = [1, 1, 1]} : vector<2x8x4xf32> to vector<1x8x4xf32>
    %10 = vector.shape_cast %9 : vector<1x8x4xf32> to vector<8x4xf32>
    %cst = arith.constant dense<0.000000e+00> : vector<8x4xf32>
    %11 = tpu.matmul %0, %10, %cst {dimension_numbers = #tpu.dot_dimension_numbers<[1], [0], [0], [1], [0, 0, 1, 1], [], []>} : vector<8x8xf32>, vector<8x4xf32>, vector<8x4xf32> -> vector<8x4xf32>
    %cst_16 = arith.constant dense<0.000000e+00> : vector<8x4xf32>
    %12 = tpu.matmul %0, %11, %cst_16 {dimension_numbers = #tpu.dot_dimension_numbers<[1], [0], [0], [1], [0, 0, 1, 1], [], []>} : vector<8x8xf32>, vector<8x4xf32>, vector<8x4xf32> -> vector<8x4xf32>
    %cst_17 = arith.constant 2.000000e+00 : f32
    %13 = vector.broadcast %cst_17 : f32 to vector<8x4xf32>
    %14 = arith.mulf %13, %12 : vector<8x4xf32>
    %15 = arith.subf %14, %10 : vector<8x4xf32>
    %16 = tpu.concatenate %10, %11, %15 in 1 : vector<8x4xf32>, vector<8x4xf32>, vector<8x4xf32> -> vector<8x12xf32>
    %17 = vector.extract_strided_slice %1 {offsets = [1, 0, 0], sizes = [1, 8, 4], strides = [1, 1, 1]} : vector<2x8x4xf32> to vector<1x8x4xf32>
    %18 = vector.shape_cast %17 : vector<1x8x4xf32> to vector<8x4xf32>
    %cst_18 = arith.constant dense<0.000000e+00> : vector<8x4xf32>
    %19 = tpu.matmul %0, %18, %cst_18 {dimension_numbers = #tpu.dot_dimension_numbers<[1], [0], [0], [1], [0, 0, 1, 1], [], []>} : vector<8x8xf32>, vector<8x4xf32>, vector<8x4xf32> -> vector<8x4xf32>
    %cst_19 = arith.constant dense<0.000000e+00> : vector<8x4xf32>
    %20 = tpu.matmul %0, %19, %cst_19 {dimension_numbers = #tpu.dot_dimension_numbers<[1], [0], [0], [1], [0, 0, 1, 1], [], []>} : vector<8x8xf32>, vector<8x4xf32>, vector<8x4xf32> -> vector<8x4xf32>
    %cst_20 = arith.constant 2.000000e+00 : f32
    %21 = vector.broadcast %cst_20 : f32 to vector<8x4xf32>
    %22 = arith.mulf %21, %20 : vector<8x4xf32>
    %23 = arith.subf %22, %18 : vector<8x4xf32>
    %24 = tpu.concatenate %18, %19, %23 in 1 : vector<8x4xf32>, vector<8x4xf32>, vector<8x4xf32> -> vector<8x12xf32>
    %25 = tpu.concatenate %16, %24 in 0 : vector<8x12xf32>, vector<8x12xf32> -> vector<16x12xf32>
    %cst_21 = arith.constant dense<0.000000e+00> : vector<16x96xf32>
    %26 = tpu.matmul %25, %2, %cst_21 {dimension_numbers = #tpu.dot_dimension_numbers<[1], [0], [0], [1], [0, 0, 1, 1], [], []>} : vector<16x12xf32>, vector<12x96xf32>, vector<16x96xf32> -> vector<16x96xf32>
    %27 = vector.broadcast %5 : vector<1x96xf32> to vector<16x96xf32>
    %28 = arith.addf %26, %27 : vector<16x96xf32>
    %29 = vector.extract_strided_slice %7 {offsets = [0, 0, 0], sizes = [1, 8, 32], strides = [1, 1, 1]} : vector<2x8x32xf32> to vector<1x8x32xf32>
    %30 = vector.shape_cast %29 : vector<1x8x32xf32> to vector<8x32xf32>
    %cst_22 = arith.constant dense<0.000000e+00> : vector<8x32xf32>
    %31 = tpu.matmul %0, %30, %cst_22 {dimension_numbers = #tpu.dot_dimension_numbers<[1], [0], [0], [1], [0, 0, 1, 1], [], []>} : vector<8x8xf32>, vector<8x32xf32>, vector<8x32xf32> -> vector<8x32xf32>
    %cst_23 = arith.constant dense<0.000000e+00> : vector<8x32xf32>
    %32 = tpu.matmul %0, %31, %cst_23 {dimension_numbers = #tpu.dot_dimension_numbers<[1], [0], [0], [1], [0, 0, 1, 1], [], []>} : vector<8x8xf32>, vector<8x32xf32>, vector<8x32xf32> -> vector<8x32xf32>
    %cst_24 = arith.constant 2.000000e+00 : f32
    %33 = vector.broadcast %cst_24 : f32 to vector<8x32xf32>
    %34 = arith.mulf %33, %32 : vector<8x32xf32>
    %35 = arith.subf %34, %30 : vector<8x32xf32>
    %36 = tpu.concatenate %30, %31, %35 in 1 : vector<8x32xf32>, vector<8x32xf32>, vector<8x32xf32> -> vector<8x96xf32>
    %37 = vector.extract_strided_slice %7 {offsets = [1, 0, 0], sizes = [1, 8, 32], strides = [1, 1, 1]} : vector<2x8x32xf32> to vector<1x8x32xf32>
    %38 = vector.shape_cast %37 : vector<1x8x32xf32> to vector<8x32xf32>
    %cst_25 = arith.constant dense<0.000000e+00> : vector<8x32xf32>
    %39 = tpu.matmul %0, %38, %cst_25 {dimension_numbers = #tpu.dot_dimension_numbers<[1], [0], [0], [1], [0, 0, 1, 1], [], []>} : vector<8x8xf32>, vector<8x32xf32>, vector<8x32xf32> -> vector<8x32xf32>
    %cst_26 = arith.constant dense<0.000000e+00> : vector<8x32xf32>
    %40 = tpu.matmul %0, %39, %cst_26 {dimension_numbers = #tpu.dot_dimension_numbers<[1], [0], [0], [1], [0, 0, 1, 1], [], []>} : vector<8x8xf32>, vector<8x32xf32>, vector<8x32xf32> -> vector<8x32xf32>
    %cst_27 = arith.constant 2.000000e+00 : f32
    %41 = vector.broadcast %cst_27 : f32 to vector<8x32xf32>
    %42 = arith.mulf %41, %40 : vector<8x32xf32>
    %43 = arith.subf %42, %38 : vector<8x32xf32>
    %44 = tpu.concatenate %38, %39, %43 in 1 : vector<8x32xf32>, vector<8x32xf32>, vector<8x32xf32> -> vector<8x96xf32>
    %45 = tpu.concatenate %36, %44 in 0 : vector<8x96xf32>, vector<8x96xf32> -> vector<16x96xf32>
    %46 = vector.extract_strided_slice %28 {offsets = [0, 0], sizes = [16, 64], strides = [1, 1]} : vector<16x96xf32> to vector<16x64xf32>
    %cst_28 = arith.constant dense<0.000000e+00> : vector<16x64xf32>
    %47 = tpu.matmul %45, %3, %cst_28 {dimension_numbers = #tpu.dot_dimension_numbers<[1], [0], [0], [1], [0, 0, 1, 1], [], []>} : vector<16x96xf32>, vector<96x64xf32>, vector<16x64xf32> -> vector<16x64xf32>
    %48 = arith.addf %46, %47 : vector<16x64xf32>
    %49 = arith.negf %48 : vector<16x64xf32>
    %50 = math.exp %49 : vector<16x64xf32>
    %cst_29 = arith.constant 1.000000e+00 : f32
    %51 = vector.broadcast %cst_29 : f32 to vector<16x64xf32>
    %52 = arith.addf %51, %50 : vector<16x64xf32>
    %53 = arith.divf %51, %52 : vector<16x64xf32>
    %54 = vector.extract_strided_slice %53 {offsets = [0, 0], sizes = [16, 32], strides = [1, 1]} : vector<16x64xf32> to vector<16x32xf32>
    %55 = vector.extract_strided_slice %53 {offsets = [0, 32], sizes = [16, 32], strides = [1, 1]} : vector<16x64xf32> to vector<16x32xf32>
    %56 = arith.mulf %54, %8 : vector<16x32xf32>
    %57 = vector.shape_cast %56 : vector<16x32xf32> to vector<2x8x32xf32>
    %58 = vector.extract_strided_slice %57 {offsets = [0, 0, 0], sizes = [1, 8, 32], strides = [1, 1, 1]} : vector<2x8x32xf32> to vector<1x8x32xf32>
    %59 = vector.shape_cast %58 : vector<1x8x32xf32> to vector<8x32xf32>
    %cst_30 = arith.constant dense<0.000000e+00> : vector<8x32xf32>
    %60 = tpu.matmul %0, %59, %cst_30 {dimension_numbers = #tpu.dot_dimension_numbers<[1], [0], [0], [1], [0, 0, 1, 1], [], []>} : vector<8x8xf32>, vector<8x32xf32>, vector<8x32xf32> -> vector<8x32xf32>
    %cst_31 = arith.constant dense<0.000000e+00> : vector<8x32xf32>
    %61 = tpu.matmul %0, %60, %cst_31 {dimension_numbers = #tpu.dot_dimension_numbers<[1], [0], [0], [1], [0, 0, 1, 1], [], []>} : vector<8x8xf32>, vector<8x32xf32>, vector<8x32xf32> -> vector<8x32xf32>
    %cst_32 = arith.constant 2.000000e+00 : f32
    %62 = vector.broadcast %cst_32 : f32 to vector<8x32xf32>
    %63 = arith.mulf %62, %61 : vector<8x32xf32>
    %64 = arith.subf %63, %59 : vector<8x32xf32>
    %65 = tpu.concatenate %59, %60, %64 in 1 : vector<8x32xf32>, vector<8x32xf32>, vector<8x32xf32> -> vector<8x96xf32>
    %66 = vector.extract_strided_slice %57 {offsets = [1, 0, 0], sizes = [1, 8, 32], strides = [1, 1, 1]} : vector<2x8x32xf32> to vector<1x8x32xf32>
    %67 = vector.shape_cast %66 : vector<1x8x32xf32> to vector<8x32xf32>
    %cst_33 = arith.constant dense<0.000000e+00> : vector<8x32xf32>
    %68 = tpu.matmul %0, %67, %cst_33 {dimension_numbers = #tpu.dot_dimension_numbers<[1], [0], [0], [1], [0, 0, 1, 1], [], []>} : vector<8x8xf32>, vector<8x32xf32>, vector<8x32xf32> -> vector<8x32xf32>
    %cst_34 = arith.constant dense<0.000000e+00> : vector<8x32xf32>
    %69 = tpu.matmul %0, %68, %cst_34 {dimension_numbers = #tpu.dot_dimension_numbers<[1], [0], [0], [1], [0, 0, 1, 1], [], []>} : vector<8x8xf32>, vector<8x32xf32>, vector<8x32xf32> -> vector<8x32xf32>
    %cst_35 = arith.constant 2.000000e+00 : f32
    %70 = vector.broadcast %cst_35 : f32 to vector<8x32xf32>
    %71 = arith.mulf %70, %69 : vector<8x32xf32>
    %72 = arith.subf %71, %67 : vector<8x32xf32>
    %73 = tpu.concatenate %67, %68, %72 in 1 : vector<8x32xf32>, vector<8x32xf32>, vector<8x32xf32> -> vector<8x96xf32>
    %74 = tpu.concatenate %65, %73 in 0 : vector<8x96xf32>, vector<8x96xf32> -> vector<16x96xf32>
    %75 = vector.extract_strided_slice %28 {offsets = [0, 64], sizes = [16, 32], strides = [1, 1]} : vector<16x96xf32> to vector<16x32xf32>
    %cst_36 = arith.constant dense<0.000000e+00> : vector<16x32xf32>
    %76 = tpu.matmul %74, %4, %cst_36 {dimension_numbers = #tpu.dot_dimension_numbers<[1], [0], [0], [1], [0, 0, 1, 1], [], []>} : vector<16x96xf32>, vector<96x32xf32>, vector<16x32xf32> -> vector<16x32xf32>
    %77 = arith.addf %75, %76 : vector<16x32xf32>
    %78 = math.tanh %77 : vector<16x32xf32>
    %79 = arith.mulf %55, %8 : vector<16x32xf32>
    %cst_37 = arith.constant 1.000000e+00 : f32
    %80 = vector.broadcast %cst_37 : f32 to vector<16x32xf32>
    %81 = arith.subf %80, %55 : vector<16x32xf32>
    %82 = arith.mulf %81, %78 : vector<16x32xf32>
    %83 = arith.addf %79, %82 : vector<16x32xf32>
    %84 = vector.shape_cast %83 : vector<16x32xf32> to vector<2x8x32xf32>
    %c0_38 = arith.constant 0 : index
    %c0_39 = arith.constant 0 : index
    %c0_40 = arith.constant 0 : index
    %c0_41 = arith.constant 0 : index
    %85 = vector.load %arg14[%c0_38, %c0_39, %c0_40, %c0_41] : memref<2x2x8x32xf32, #tpu.memory_space<vmem>>, vector<1x2x8x32xf32>
    %86 = vector.shape_cast %85 : vector<1x2x8x32xf32> to vector<2x8x32xf32>
    %87 = vector.shape_cast %84 : vector<2x8x32xf32> to vector<1x2x8x32xf32>
    tpu.vector_store %arg14[%c0_38, %c0_39, %c0_40, %c0_41], %87 {strides = array<i32>} : memref<2x2x8x32xf32, #tpu.memory_space<vmem>>, vector<1x2x8x32xf32>,
    %88 = vector.shape_cast %83 : vector<16x32xf32> to vector<2x8x32xf32>
    %c0_42 = arith.constant 0 : index
    %c0_43 = arith.constant 0 : index
    %89 = vector.load %arg8[%c0_42, %c0_43] : memref<96x96xf32, #tpu.memory_space<vmem>>, vector<96x96xf32>
    %c0_44 = arith.constant 0 : index
    %c0_45 = arith.constant 0 : index
    %90 = vector.load %arg9[%c0_44, %c0_45] : memref<96x64xf32, #tpu.memory_space<vmem>>, vector<96x64xf32>
    %c0_46 = arith.constant 0 : index
    %c0_47 = arith.constant 0 : index
    %91 = vector.load %arg10[%c0_46, %c0_47] : memref<96x32xf32, #tpu.memory_space<vmem>>, vector<96x32xf32>
    %c0_48 = arith.constant 0 : index
    %c0_49 = arith.constant 0 : index
    %92 = vector.load %arg11[%c0_48, %c0_49] : memref<1x96xf32, #tpu.memory_space<vmem>>, vector<1x96xf32>
    %c1 = arith.constant 1 : index
    %c0_50 = arith.constant 0 : index
    %c0_51 = arith.constant 0 : index
    %c0_52 = arith.constant 0 : index
    %93 = vector.load %arg3[%c1, %c0_50, %c0_51, %c0_52] : memref<2x2x8x32xf32, #tpu.memory_space<vmem>>, vector<1x2x8x32xf32>
    %94 = vector.shape_cast %93 : vector<1x2x8x32xf32> to vector<2x8x32xf32>
    %95 = vector.shape_cast %94 : vector<2x8x32xf32> to vector<16x32xf32>
    %96 = vector.extract_strided_slice %88 {offsets = [0, 0, 0], sizes = [1, 8, 32], strides = [1, 1, 1]} : vector<2x8x32xf32> to vector<1x8x32xf32>
    %97 = vector.shape_cast %96 : vector<1x8x32xf32> to vector<8x32xf32>
    %cst_53 = arith.constant dense<0.000000e+00> : vector<8x32xf32>
    %98 = tpu.matmul %0, %97, %cst_53 {dimension_numbers = #tpu.dot_dimension_numbers<[1], [0], [0], [1], [0, 0, 1, 1], [], []>} : vector<8x8xf32>, vector<8x32xf32>, vector<8x32xf32> -> vector<8x32xf32>
    %cst_54 = arith.constant dense<0.000000e+00> : vector<8x32xf32>
    %99 = tpu.matmul %0, %98, %cst_54 {dimension_numbers = #tpu.dot_dimension_numbers<[1], [0], [0], [1], [0, 0, 1, 1], [], []>} : vector<8x8xf32>, vector<8x32xf32>, vector<8x32xf32> -> vector<8x32xf32>
    %cst_55 = arith.constant 2.000000e+00 : f32
    %100 = vector.broadcast %cst_55 : f32 to vector<8x32xf32>
    %101 = arith.mulf %100, %99 : vector<8x32xf32>
    %102 = arith.subf %101, %97 : vector<8x32xf32>
    %103 = tpu.concatenate %97, %98, %102 in 1 : vector<8x32xf32>, vector<8x32xf32>, vector<8x32xf32> -> vector<8x96xf32>
    %104 = vector.extract_strided_slice %88 {offsets = [1, 0, 0], sizes = [1, 8, 32], strides = [1, 1, 1]} : vector<2x8x32xf32> to vector<1x8x32xf32>
    %105 = vector.shape_cast %104 : vector<1x8x32xf32> to vector<8x32xf32>
    %cst_56 = arith.constant dense<0.000000e+00> : vector<8x32xf32>
    %106 = tpu.matmul %0, %105, %cst_56 {dimension_numbers = #tpu.dot_dimension_numbers<[1], [0], [0], [1], [0, 0, 1, 1], [], []>} : vector<8x8xf32>, vector<8x32xf32>, vector<8x32xf32> -> vector<8x32xf32>
    %cst_57 = arith.constant dense<0.000000e+00> : vector<8x32xf32>
    %107 = tpu.matmul %0, %106, %cst_57 {dimension_numbers = #tpu.dot_dimension_numbers<[1], [0], [0], [1], [0, 0, 1, 1], [], []>} : vector<8x8xf32>, vector<8x32xf32>, vector<8x32xf32> -> vector<8x32xf32>
    %cst_58 = arith.constant 2.000000e+00 : f32
    %108 = vector.broadcast %cst_58 : f32 to vector<8x32xf32>
    %109 = arith.mulf %108, %107 : vector<8x32xf32>
    %110 = arith.subf %109, %105 : vector<8x32xf32>
    %111 = tpu.concatenate %105, %106, %110 in 1 : vector<8x32xf32>, vector<8x32xf32>, vector<8x32xf32> -> vector<8x96xf32>
    %112 = tpu.concatenate %103, %111 in 0 : vector<8x96xf32>, vector<8x96xf32> -> vector<16x96xf32>
    %cst_59 = arith.constant dense<0.000000e+00> : vector<16x96xf32>
    %113 = tpu.matmul %112, %89, %cst_59 {dimension_numbers = #tpu.dot_dimension_numbers<[1], [0], [0], [1], [0, 0, 1, 1], [], []>} : vector<16x96xf32>, vector<96x96xf32>, vector<16x96xf32> -> vector<16x96xf32>
    %114 = vector.broadcast %92 : vector<1x96xf32> to vector<16x96xf32>
    %115 = arith.addf %113, %114 : vector<16x96xf32>
    %116 = vector.extract_strided_slice %94 {offsets = [0, 0, 0], sizes = [1, 8, 32], strides = [1, 1, 1]} : vector<2x8x32xf32> to vector<1x8x32xf32>
    %117 = vector.shape_cast %116 : vector<1x8x32xf32> to vector<8x32xf32>
    %cst_60 = arith.constant dense<0.000000e+00> : vector<8x32xf32>
    %118 = tpu.matmul %0, %117, %cst_60 {dimension_numbers = #tpu.dot_dimension_numbers<[1], [0], [0], [1], [0, 0, 1, 1], [], []>} : vector<8x8xf32>, vector<8x32xf32>, vector<8x32xf32> -> vector<8x32xf32>
    %cst_61 = arith.constant dense<0.000000e+00> : vector<8x32xf32>
    %119 = tpu.matmul %0, %118, %cst_61 {dimension_numbers = #tpu.dot_dimension_numbers<[1], [0], [0], [1], [0, 0, 1, 1], [], []>} : vector<8x8xf32>, vector<8x32xf32>, vector<8x32xf32> -> vector<8x32xf32>
    %cst_62 = arith.constant 2.000000e+00 : f32
    %120 = vector.broadcast %cst_62 : f32 to vector<8x32xf32>
    %121 = arith.mulf %120, %119 : vector<8x32xf32>
    %122 = arith.subf %121, %117 : vector<8x32xf32>
    %123 = tpu.concatenate %117, %118, %122 in 1 : vector<8x32xf32>, vector<8x32xf32>, vector<8x32xf32> -> vector<8x96xf32>
    %124 = vector.extract_strided_slice %94 {offsets = [1, 0, 0], sizes = [1, 8, 32], strides = [1, 1, 1]} : vector<2x8x32xf32> to vector<1x8x32xf32>
    %125 = vector.shape_cast %124 : vector<1x8x32xf32> to vector<8x32xf32>
    %cst_63 = arith.constant dense<0.000000e+00> : vector<8x32xf32>
    %126 = tpu.matmul %0, %125, %cst_63 {dimension_numbers = #tpu.dot_dimension_numbers<[1], [0], [0], [1], [0, 0, 1, 1], [], []>} : vector<8x8xf32>, vector<8x32xf32>, vector<8x32xf32> -> vector<8x32xf32>
    %cst_64 = arith.constant dense<0.000000e+00> : vector<8x32xf32>
    %127 = tpu.matmul %0, %126, %cst_64 {dimension_numbers = #tpu.dot_dimension_numbers<[1], [0], [0], [1], [0, 0, 1, 1], [], []>} : vector<8x8xf32>, vector<8x32xf32>, vector<8x32xf32> -> vector<8x32xf32>
    %cst_65 = arith.constant 2.000000e+00 : f32
    %128 = vector.broadcast %cst_65 : f32 to vector<8x32xf32>
    %129 = arith.mulf %128, %127 : vector<8x32xf32>
    %130 = arith.subf %129, %125 : vector<8x32xf32>
    %131 = tpu.concatenate %125, %126, %130 in 1 : vector<8x32xf32>, vector<8x32xf32>, vector<8x32xf32> -> vector<8x96xf32>
    %132 = tpu.concatenate %123, %131 in 0 : vector<8x96xf32>, vector<8x96xf32> -> vector<16x96xf32>
    %133 = vector.extract_strided_slice %115 {offsets = [0, 0], sizes = [16, 64], strides = [1, 1]} : vector<16x96xf32> to vector<16x64xf32>
    %cst_66 = arith.constant dense<0.000000e+00> : vector<16x64xf32>
    %134 = tpu.matmul %132, %90, %cst_66 {dimension_numbers = #tpu.dot_dimension_numbers<[1], [0], [0], [1], [0, 0, 1, 1], [], []>} : vector<16x96xf32>, vector<96x64xf32>, vector<16x64xf32> -> vector<16x64xf32>
    %135 = arith.addf %133, %134 : vector<16x64xf32>
    %136 = arith.negf %135 : vector<16x64xf32>
    %137 = math.exp %136 : vector<16x64xf32>
    %cst_67 = arith.constant 1.000000e+00 : f32
    %138 = vector.broadcast %cst_67 : f32 to vector<16x64xf32>
    %139 = arith.addf %138, %137 : vector<16x64xf32>
    %140 = arith.divf %138, %139 : vector<16x64xf32>
    %141 = vector.extract_strided_slice %140 {offsets = [0, 0], sizes = [16, 32], strides = [1, 1]} : vector<16x64xf32> to vector<16x32xf32>
    %142 = vector.extract_strided_slice %140 {offsets = [0, 32], sizes = [16, 32], strides = [1, 1]} : vector<16x64xf32> to vector<16x32xf32>
    %143 = arith.mulf %141, %95 : vector<16x32xf32>
    %144 = vector.shape_cast %143 : vector<16x32xf32> to vector<2x8x32xf32>
    %145 = vector.extract_strided_slice %144 {offsets = [0, 0, 0], sizes = [1, 8, 32], strides = [1, 1, 1]} : vector<2x8x32xf32> to vector<1x8x32xf32>
    %146 = vector.shape_cast %145 : vector<1x8x32xf32> to vector<8x32xf32>
    %cst_68 = arith.constant dense<0.000000e+00> : vector<8x32xf32>
    %147 = tpu.matmul %0, %146, %cst_68 {dimension_numbers = #tpu.dot_dimension_numbers<[1], [0], [0], [1], [0, 0, 1, 1], [], []>} : vector<8x8xf32>, vector<8x32xf32>, vector<8x32xf32> -> vector<8x32xf32>
    %cst_69 = arith.constant dense<0.000000e+00> : vector<8x32xf32>
    %148 = tpu.matmul %0, %147, %cst_69 {dimension_numbers = #tpu.dot_dimension_numbers<[1], [0], [0], [1], [0, 0, 1, 1], [], []>} : vector<8x8xf32>, vector<8x32xf32>, vector<8x32xf32> -> vector<8x32xf32>
    %cst_70 = arith.constant 2.000000e+00 : f32
    %149 = vector.broadcast %cst_70 : f32 to vector<8x32xf32>
    %150 = arith.mulf %149, %148 : vector<8x32xf32>
    %151 = arith.subf %150, %146 : vector<8x32xf32>
    %152 = tpu.concatenate %146, %147, %151 in 1 : vector<8x32xf32>, vector<8x32xf32>, vector<8x32xf32> -> vector<8x96xf32>
    %153 = vector.extract_strided_slice %144 {offsets = [1, 0, 0], sizes = [1, 8, 32], strides = [1, 1, 1]} : vector<2x8x32xf32> to vector<1x8x32xf32>
    %154 = vector.shape_cast %153 : vector<1x8x32xf32> to vector<8x32xf32>
    %cst_71 = arith.constant dense<0.000000e+00> : vector<8x32xf32>
    %155 = tpu.matmul %0, %154, %cst_71 {dimension_numbers = #tpu.dot_dimension_numbers<[1], [0], [0], [1], [0, 0, 1, 1], [], []>} : vector<8x8xf32>, vector<8x32xf32>, vector<8x32xf32> -> vector<8x32xf32>
    %cst_72 = arith.constant dense<0.000000e+00> : vector<8x32xf32>
    %156 = tpu.matmul %0, %155, %cst_72 {dimension_numbers = #tpu.dot_dimension_numbers<[1], [0], [0], [1], [0, 0, 1, 1], [], []>} : vector<8x8xf32>, vector<8x32xf32>, vector<8x32xf32> -> vector<8x32xf32>
    %cst_73 = arith.constant 2.000000e+00 : f32
    %157 = vector.broadcast %cst_73 : f32 to vector<8x32xf32>
    %158 = arith.mulf %157, %156 : vector<8x32xf32>
    %159 = arith.subf %158, %154 : vector<8x32xf32>
    %160 = tpu.concatenate %154, %155, %159 in 1 : vector<8x32xf32>, vector<8x32xf32>, vector<8x32xf32> -> vector<8x96xf32>
    %161 = tpu.concatenate %152, %160 in 0 : vector<8x96xf32>, vector<8x96xf32> -> vector<16x96xf32>
    %162 = vector.extract_strided_slice %115 {offsets = [0, 64], sizes = [16, 32], strides = [1, 1]} : vector<16x96xf32> to vector<16x32xf32>
    %cst_74 = arith.constant dense<0.000000e+00> : vector<16x32xf32>
    %163 = tpu.matmul %161, %91, %cst_74 {dimension_numbers = #tpu.dot_dimension_numbers<[1], [0], [0], [1], [0, 0, 1, 1], [], []>} : vector<16x96xf32>, vector<96x32xf32>, vector<16x32xf32> -> vector<16x32xf32>
    %164 = arith.addf %162, %163 : vector<16x32xf32>
    %165 = math.tanh %164 : vector<16x32xf32>
    %166 = arith.mulf %142, %95 : vector<16x32xf32>
    %cst_75 = arith.constant 1.000000e+00 : f32
    %167 = vector.broadcast %cst_75 : f32 to vector<16x32xf32>
    %168 = arith.subf %167, %142 : vector<16x32xf32>
    %169 = arith.mulf %168, %165 : vector<16x32xf32>
    %170 = arith.addf %166, %169 : vector<16x32xf32>
    %171 = vector.shape_cast %170 : vector<16x32xf32> to vector<2x8x32xf32>
    %c1_76 = arith.constant 1 : index
    %c0_77 = arith.constant 0 : index
    %c0_78 = arith.constant 0 : index
    %c0_79 = arith.constant 0 : index
    %172 = vector.load %arg14[%c1_76, %c0_77, %c0_78, %c0_79] : memref<2x2x8x32xf32, #tpu.memory_space<vmem>>, vector<1x2x8x32xf32>
    %173 = vector.shape_cast %172 : vector<1x2x8x32xf32> to vector<2x8x32xf32>
    %174 = vector.shape_cast %171 : vector<2x8x32xf32> to vector<1x2x8x32xf32>
    tpu.vector_store %arg14[%c1_76, %c0_77, %c0_78, %c0_79], %174 {strides = array<i32>} : memref<2x2x8x32xf32, #tpu.memory_space<vmem>>, vector<1x2x8x32xf32>,
    %175 = vector.shape_cast %170 : vector<16x32xf32> to vector<2x8x32xf32>
    %176 = vector.shape_cast %175 : vector<2x8x32xf32> to vector<16x32xf32>
    %c0_80 = arith.constant 0 : index
    %c0_81 = arith.constant 0 : index
    %177 = vector.load %arg12[%c0_80, %c0_81] : memref<32x4xf32, #tpu.memory_space<vmem>>, vector<32x4xf32>
    %cst_82 = arith.constant dense<0.000000e+00> : vector<16x4xf32>
    %178 = tpu.matmul %176, %177, %cst_82 {dimension_numbers = #tpu.dot_dimension_numbers<[1], [0], [0], [1], [0, 0, 1, 1], [], []>} : vector<16x32xf32>, vector<32x4xf32>, vector<16x4xf32> -> vector<16x4xf32>
    %c0_83 = arith.constant 0 : index
    %c0_84 = arith.constant 0 : index
    %179 = vector.load %arg13[%c0_83, %c0_84] : memref<1x4xf32, #tpu.memory_space<vmem>>, vector<1x4xf32>
    %180 = vector.broadcast %179 : vector<1x4xf32> to vector<16x4xf32>
    %181 = arith.addf %178, %180 : vector<16x4xf32>
    %182 = vector.shape_cast %181 : vector<16x4xf32> to vector<2x8x4xf32>
    %c0_85 = arith.constant 0 : index
    %c0_86 = arith.constant 0 : index
    %c0_87 = arith.constant 0 : index
    %183 = vector.load %arg15[%c0_85, %c0_86, %c0_87] : memref<2x8x4xf32, #tpu.memory_space<vmem>>, vector<2x8x4xf32>
    tpu.vector_store %arg15[%c0_85, %c0_86, %c0_87], %182 {strides = array<i32>} : memref<2x8x4xf32, #tpu.memory_space<vmem>>, vector<2x8x4xf32>,
    return
  }
  func.func @transform_0(%arg0: i32) -> (i32, i32) {
    %c0_i32 = arith.constant 0 : i32
    %c0_i32_0 = arith.constant 0 : i32
    %c0_i32_1 = arith.constant 0 : i32
    return %c0_i32, %c0_i32_0 : i32, i32
  }
  func.func @transform_1(%arg0: i32) -> (i32, i32, i32) {
    %c0_i32 = arith.constant 0 : i32
    %c0_i32_0 = arith.constant 0 : i32
    %c0_i32_1 = arith.constant 0 : i32
    return %arg0, %c0_i32, %c0_i32_0 : i32, i32, i32
  }
  func.func @transform_2(%arg0: i32) -> (i32, i32, i32, i32) {
    %c0_i32 = arith.constant 0 : i32
    %c0_i32_0 = arith.constant 0 : i32
    %c0_i32_1 = arith.constant 0 : i32
    %c0_i32_2 = arith.constant 0 : i32
    return %c0_i32, %arg0, %c0_i32_0, %c0_i32_1 : i32, i32, i32, i32
  }
  func.func @transform_3(%arg0: i32) -> (i32, i32) {
    %c0_i32 = arith.constant 0 : i32
    %c0_i32_0 = arith.constant 0 : i32
    %c0_i32_1 = arith.constant 0 : i32
    return %c0_i32, %c0_i32_0 : i32, i32
  }
  func.func @transform_4(%arg0: i32) -> (i32, i32) {
    %c0_i32 = arith.constant 0 : i32
    %c0_i32_0 = arith.constant 0 : i32
    %c0_i32_1 = arith.constant 0 : i32
    return %c0_i32, %c0_i32_0 : i32, i32
  }
  func.func @transform_5(%arg0: i32) -> (i32, i32) {
    %c0_i32 = arith.constant 0 : i32
    %c0_i32_0 = arith.constant 0 : i32
    %c0_i32_1 = arith.constant 0 : i32
    return %c0_i32, %c0_i32_0 : i32, i32
  }
  func.func @transform_6(%arg0: i32) -> (i32, i32) {
    %c0_i32 = arith.constant 0 : i32
    %c0_i32_0 = arith.constant 0 : i32
    %c0_i32_1 = arith.constant 0 : i32
    return %c0_i32, %c0_i32_0 : i32, i32
  }
  func.func @transform_7(%arg0: i32) -> (i32, i32) {
    %c0_i32 = arith.constant 0 : i32
    %c0_i32_0 = arith.constant 0 : i32
    %c0_i32_1 = arith.constant 0 : i32
    return %c0_i32, %c0_i32_0 : i32, i32
  }
  func.func @transform_8(%arg0: i32) -> (i32, i32) {
    %c0_i32 = arith.constant 0 : i32
    %c0_i32_0 = arith.constant 0 : i32
    %c0_i32_1 = arith.constant 0 : i32
    return %c0_i32, %c0_i32_0 : i32, i32
  }
  func.func @transform_9(%arg0: i32) -> (i32, i32) {
    %c0_i32 = arith.constant 0 : i32
    %c0_i32_0 = arith.constant 0 : i32
    %c0_i32_1 = arith.constant 0 : i32
    return %c0_i32, %c0_i32_0 : i32, i32
  }
  func.func @transform_10(%arg0: i32) -> (i32, i32) {
    %c0_i32 = arith.constant 0 : i32
    %c0_i32_0 = arith.constant 0 : i32
    %c0_i32_1 = arith.constant 0 : i32
    return %c0_i32, %c0_i32_0 : i32, i32
  }
  func.func @transform_11(%arg0: i32) -> (i32, i32) {
    %c0_i32 = arith.constant 0 : i32
    %c0_i32_0 = arith.constant 0 : i32
    %c0_i32_1 = arith.constant 0 : i32
    return %c0_i32, %c0_i32_0 : i32, i32
  }
  func.func @transform_12(%arg0: i32) -> (i32, i32) {
    %c0_i32 = arith.constant 0 : i32
    %c0_i32_0 = arith.constant 0 : i32
    %c0_i32_1 = arith.constant 0 : i32
    return %c0_i32, %c0_i32_0 : i32, i32
  }
  func.func @transform_13(%arg0: i32) -> (i32, i32, i32, i32) {
    %c0_i32 = arith.constant 0 : i32
    %c0_i32_0 = arith.constant 0 : i32
    %c0_i32_1 = arith.constant 0 : i32
    %c0_i32_2 = arith.constant 0 : i32
    return %c0_i32, %arg0, %c0_i32_0, %c0_i32_1 : i32, i32, i32, i32
  }
  func.func @transform_14(%arg0: i32) -> (i32, i32, i32) {
    %c0_i32 = arith.constant 0 : i32
    %c0_i32_0 = arith.constant 0 : i32
    %c0_i32_1 = arith.constant 0 : i32
    return %arg0, %c0_i32, %c0_i32_0 : i32, i32, i32
  }
}

</mosaic_0001>

<bundles_post_ra>
// kernel: decoder_forward.1
= control target key start
LH: loop header
LB: loop body
LE: loop exit
PB: predicated region body
PF: predicated region fallthrough
CT: control target
= control target key end

     0   :  { %vm78_vm0 = vcmask 64512   ;;  %s1236_s19 = smov 4   ;;  %vm197_vm1 = vcmask 1043456   ;;  %s1237_s22 = smov 8   ;;  %vm132_vm2 = vcmask 31744   ;;  %vm190_vm3 = vcmask 97280   ;;  %s1787_s1 = inlined_call_operand.vmem [shape: f32[2,8,4], index: 1, kind: input, shape index: {}]   ;;  %s1788_s0 = inlined_call_operand.vmem [shape: f32[8,8], index: 0, kind: input, shape index: {}]   ;;  %s1789_s2 = inlined_call_operand.vmem [shape: f32[2,2,8,32], index: 2, kind: input, shape index: {}, may-alias: {2,13}]   ;;  %s1790_s3 = inlined_call_operand.vmem [shape: f32[12,96], index: 3, kind: input, shape index: {}]   ;;  %s1791_s6 = inlined_call_operand.vmem [shape: f32[1,96], index: 6, kind: input, shape index: {}]   ;;  %s1792_s4 = inlined_call_operand.vmem [shape: f32[96,64], index: 4, kind: input, shape index: {}]   ;;  %s1793_s5 = inlined_call_operand.vmem [shape: f32[96,32], index: 5, kind: input, shape index: {}]   ;;  %s1794_s13 = inlined_call_operand.vmem [shape: f32[2,2,8,32], index: 13, kind: output, shape index: {0}, may-alias: {2,13}]   ;;  %s1795_s7 = inlined_call_operand.vmem [shape: f32[96,96], index: 7, kind: input, shape index: {}]   ;;  %s1796_s8 = inlined_call_operand.vmem [shape: f32[96,64], index: 8, kind: input, shape index: {}]   ;;  %s1797_s10 = inlined_call_operand.vmem [shape: f32[1,96], index: 10, kind: input, shape index: {}]   ;;  %s1798_s9 = inlined_call_operand.vmem [shape: f32[96,32], index: 9, kind: input, shape index: {}]   ;;  %s1799_s11 = inlined_call_operand.vmem [shape: f32[32,4], index: 11, kind: input, shape index: {}]   ;;  %s1800_s12 = inlined_call_operand.vmem [shape: f32[1,4], index: 12, kind: input, shape index: {}]   ;;  %s1801_s14 = inlined_call_operand.vmem [shape: f32[2,8,4], index: 14, kind: output, shape index: {1}]  }
   0x1   :  { %v47_v0 = vld [vmem:[%s1787_s1] sm:$0xff]  ;;  %v1329_v3 = vld [vmem:[%s1787_s1 + $0x8] sm:$0xff]  ;;  %s1238_s25 = smov 32   ;;  %v62_v24 = vld [vmem:[%s1792_s4 + $0x58] sm:$0xff]  ;;  %vm274_vm4 = vcmask 261120   ;;  %vm276_vm5 = vcmask 523264  }
   0x2   :  { %v1322_v1 = vld [vmem:[%s1788_s0] sm:$0xff]  ;;  %97 = vmatpush.msra.mxu0 %v47_v0  ;;  %v50_v5 = vld [vmem:[%s1790_s3 + $0x8] sm:$0xf]  ;;  %v61_v25 = vld [vmem:[%s1792_s4 + $0x50] sm:$0xff]  ;;  %vm330_vm6 = vcmask 785408  }
   0x3   :  { %1157 = vmatmul.msk.f32.vlgmr.msra.gmra.mxu0 %vm78_vm0, %v1322_v1  ;;  %v1334_v4 = vld [vmem:[%s1789_s2] sm:$0xff]  ;;  %v1350_v10 = vld [vmem:[%s1789_s2 + $0x8] sm:$0xff]  ;;  %v58_v28 = vld [vmem:[%s1792_s4 + $0x38] sm:$0xff] }
   0x4   :  { %1161 = vmatpush.msk.msrb.mxu0 %vm197_vm1, %v50_v5  ;;  %v49_v12 = vld [vmem:[%s1790_s3] sm:$0xff]  ;;  %s1239_s3 = smov 64   ;;  %v60_v26 = vld [vmem:[%s1792_s4 + $0x48] sm:$0xff]  ;;  %v57_v29 = vld [vmem:[%s1792_s4 + $0x30] sm:$0xff] }
   0x5   :  { %v59_v27 = vld [vmem:[%s1792_s4 + $0x40] sm:$0xff]  ;;  %v56_v30 = vld [vmem:[%s1792_s4 + $0x28] sm:$0xff]  ;;  %v54_v32 = vld [vmem:[%s1792_s4 + $0x18] sm:$0xff] }
   0x6   :  { %216 = vmatpush.msrb.mxu0 %v49_v12  ;;  %v55_v31 = vld [vmem:[%s1792_s4 + $0x20] sm:$0xff]  ;;  %v53_v33 = vld [vmem:[%s1792_s4 + $0x10] sm:$0xff]  ;;  %v52_v34 = vld [vmem:[%s1792_s4 + $0x8] sm:$0xff] }
   0x7   :  { %v51_v35 = vld [vmem:[%s1792_s4] sm:$0xff] }
   0x8   :  { %341 = vmatpush.msra.mxu0 %v62_v24  ;;  %v1209_v49 = vld [vmem:[%s1791_s6] ss:$0 sm:$0xff] }
   0xa   :  { %342 = vmatpush.msra.mxu0 %v61_v25 }
   0xc   :  { %343 = vmatpush.msra.mxu0 %v60_v26 }
   0xe   :  { %344 = vmatpush.msra.mxu0 %v59_v27 }
  0x10   :  { %345 = vmatpush.msra.mxu0 %v58_v28  ;;  %v74_v28 = vld [vmem:[%s1793_s5 + $0x58] sm:$0xff] }
  0x12   :  { %346 = vmatpush.msra.mxu0 %v57_v29  ;;  %v73_v29 = vld [vmem:[%s1793_s5 + $0x50] sm:$0xff] }
  0x14   :  { %347 = vmatpush.msra.mxu0 %v56_v30  ;;  %v72_v30 = vld [vmem:[%s1793_s5 + $0x48] sm:$0xff] }
  0x16   :  { %348 = vmatpush.msra.mxu0 %v55_v31 }
  0x18   :  { %349 = vmatpush.msra.mxu0 %v54_v32 }
  0x1a   :  { %350 = vmatpush.msra.mxu0 %v53_v33 }
  0x1c   :  { %351 = vmatpush.msra.mxu0 %v52_v34 }
  0x1e   :  { %352 = vmatpush.msra.mxu0 %v51_v35  ;;  %v71_v35 = vld [vmem:[%s1793_s5 + $0x40] sm:$0xff] }
  0x80   :  { %v99_v2 = vpop.f32.mrf.mxu0 }
  0x81   :  { %125 = vrot.lane.b32.xlu0 %v99_v2, %s1236_s19  ;;  %117 = vmatpush.msra.mxu1 %v99_v2 }
  0x82   :  { %1158 = vmatmul.msk.f32.vlgmr.msra.gmra.mxu1 %vm78_vm0, %v1322_v1 }
  0x83   :  { %150 = vmatpush.msrb.mxu1 %v1329_v3 }
  0x85   :  { %239 = vmatpush.msra.mxu1 %v1334_v4 }
  0x8a   :  { %1159 = vmatmul.msk.f32.vlgmr.msrb.gmra.mxu1 %vm78_vm0, %v1322_v1 }
  0x92   :  { %1164 = vmatmul.msk.f32.vlgmr.msra.gmra.mxu1 %vm78_vm0, %v1322_v1 }
  0xf3   :  { %v126_v13 = vpop.permute.xlu0 %125 }
  0xf4   :  { %v133_v14 = vsel %vm132_vm2, %v47_v0, %v126_v13 }
  0xff   :  { %v119_v6 = vpop.f32.mrf.mxu1 }
 0x100   :  { %v122_v7 = vmul.f32 2.0, %v119_v6 }
 0x102   :  { %v123_v8 = vsub.f32 %v122_v7, %v47_v0 }
 0x104   :  { %129 = vrot.lane.b32.xlu0 %v123_v8, %s1237_s22 }
 0x107   :  { %v152_v9 = vpop.f32.mrf.mxu1 }
 0x108   :  { %178 = vrot.lane.b32.xlu1 %v152_v9, %s1236_s19  ;;  %170 = vmatpush.msra.mxu3 %v152_v9 }
 0x109   :  { %1160 = vmatmul.msk.f32.vlgmr.msra.gmra.mxu3 %vm78_vm0, %v1322_v1 }
 0x10a   :  { %293 = vmatpush.msrb.mxu3 %v1350_v10 }
 0x10f   :  { %v241_v11 = vpop.f32.mrf.mxu1 }
 0x110   :  { %259 = vmatpush.msra.mxu2 %v241_v11  ;;  %267 = vrot.lane.b32.xlu2 %v241_v11, %s1238_s25 }
 0x111   :  { %1165 = vmatmul.msk.f32.vlgmr.msra.gmra.mxu2 %vm78_vm0, %v1322_v1  ;;  %1166 = vmatmul.msk.f32.vlgmr.msrb.gmra.mxu3 %vm78_vm0, %v1322_v1 }
 0x16a   :  { %v268_v37 = vpop.permute.xlu2 %267 }
 0x16b   :  { %v275_v42 = vsel %vm274_vm4, %v1334_v4, %v268_v37  ;;  %v69_v37 = vld [vmem:[%s1793_s5 + $0x30] sm:$0xff] }
 0x176   :  { %v130_v15 = vpop.permute.xlu0 %129 }
 0x177   :  { %v134_v16 = vsel %vm78_vm0, %v133_v14, %v130_v15 }
 0x178   :  { %1162 = vmatmul.msk.f32.vlgmr.msrb.gmra.mxu0 %vm190_vm3, %v134_v16 }
 0x17a   :  { %v179_v36 = vpop.permute.xlu1 %178 }
 0x17b   :  { %v185_v38 = vsel %vm132_vm2, %v1329_v3, %v179_v36  ;;  %v70_v36 = vld [vmem:[%s1793_s5 + $0x38] sm:$0xff] }
 0x18c   :  { %v172_v17 = vpop.f32.mrf.mxu3 }
 0x18d   :  { %v175_v18 = vmul.f32 2.0, %v172_v17 }
 0x18f   :  { %v176_v19 = vsub.f32 %v175_v18, %v1329_v3 }
 0x191   :  { %182 = vrot.lane.b32.xlu1 %v176_v19, %s1237_s22 }
 0x194   :  { %v261_v20 = vpop.f32.mrf.mxu2  ;;  %v295_v21 = vpop.f32.mrf.mxu3 }
 0x195   :  { %v264_v22 = vmul.f32 2.0, %v261_v20  ;;  %313 = vmatpush.msrb.mxu1 %v295_v21  ;;  %321 = vrot.lane.b32.xlu0 %v295_v21, %s1238_s25 }
 0x196   :  { %1167 = vmatmul.msk.f32.vlgmr.msrb.gmra.mxu1 %vm78_vm0, %v1322_v1 }
 0x197   :  { %v265_v23 = vsub.f32 %v264_v22, %v1334_v4 }
 0x199   :  { %271 = vrot.lane.b32.xlu2 %v265_v23, %s1239_s3 }
 0x1f3   :  { %v272_v41 = vpop.permute.xlu2 %271 }
 0x1f4   :  { %v277_v43 = vsel %vm276_vm5, %v275_v42, %v272_v41  ;;  %v65_v41 = vld [vmem:[%s1793_s5 + $0x10] sm:$0xff]  ;;  %v64_v42 = vld [vmem:[%s1793_s5 + $0x8] sm:$0xff] }
 0x1f5   :  { %v218_v47 = vpop.f32.mrf.mxu0 }
 0x1f6   :  { %v1421_v51 = vadd.f32 %v1209_v49, %v218_v47 }
 0x203   :  { %v183_v39 = vpop.permute.xlu1 %182 }
 0x204   :  { %v186_v40 = vsel %vm78_vm0, %v185_v38, %v183_v39  ;;  %v68_v38 = vld [vmem:[%s1793_s5 + $0x28] sm:$0xff]  ;;  %v67_v39 = vld [vmem:[%s1793_s5 + $0x20] sm:$0xff] }
 0x205   :  { %1163 = vmatmul.msk.f32.gmra.mxu0 %vm190_vm3, %v186_v40  ;;  %v66_v40 = vld [vmem:[%s1793_s5 + $0x18] sm:$0xff] }
 0x207   :  { %v322_v50 = vpop.permute.xlu0 %321 }
 0x208   :  { %v328_v52 = vsel %vm274_vm4, %v1350_v10, %v322_v50 }
 0x20d   :  { %1168 = vmatmul.msk.f32.vlgmr.msra.gmra.mxu0 %vm330_vm6, %v277_v43  ;;  %v63_v43 = vld [vmem:[%s1793_s5] sm:$0xff]  ;;  %s1240_s5 = smov 96  }
 0x213   :  { %v315_v44 = vpop.f32.mrf.mxu1 }
 0x214   :  { %v318_v45 = vmul.f32 2.0, %v315_v44 }
 0x216   :  { %v319_v46 = vsub.f32 %v318_v45, %v1350_v10 }
 0x218   :  { %325 = vrot.lane.b32.xlu1 %v319_v46, %s1239_s3 }
 0x282   :  { %v221_v48 = vpop.f32.mrf.mxu0 }
 0x283   :  { %v1437_v9 = vadd.f32 %v1209_v49, %v221_v48 }
 0x28a   :  { %v326_v53 = vpop.permute.xlu1 %325  ;;  %v354_v54 = vpop.f32.mrf.mxu0 }
 0x28b   :  { %v360_v55 = vadd.f32 %v354_v54, %v1421_v51  ;;  %v329_v56 = vsel %vm276_vm5, %v328_v52, %v326_v53 }
 0x28c   :  { %1169 = vmatmul.msk.f32.gmra.mxu0 %vm330_vm6, %v329_v56 }
 0x28d   :  { %v1170_v57 = vmul.f32 -1.442695, %v360_v55 }
 0x28f   :  { %1212 = vpow2.f32 %v1170_v57 }
 0x295   :  { %v1213_v58 = vpop.eup %1212 }
 0x296   :  { %v368_v59 = vadd.f32 1.0, %v1213_v58 }
 0x298   :  { %1214 = vrcp.f32 %v368_v59  ;;  %v381_v63 = vand.u32 2147483648, %v368_v59  ;;  %v379_v2 = vand.u32 2147483647, %v368_v59  ;;  %vm375_vm8 = vweird.f32 %v368_v59 }
 0x29a   :  { %v382_v5 = vor.u32 1.1754944e-38, %v381_v63  ;;  %vm380_vm10 = vcmp.eq.f32.partialorder %v379_v2, 8.507059e+37 }
 0x29e   :  { %v1215_v60 = vpop.eup %1214 }
 0x29f   :  { %v371_v61 = vmul.f32 %v1215_v60, %v368_v59  ;;  %vm376_vm7 = vweird.f32 %v1215_v60 }
 0x2a0   :  { %vm377_vm9 = vmor %vm375_vm8, %vm376_vm7 }
 0x2a1   :  { %v372_v62 = vsub.f32 1.0, %v371_v61 }
 0x2a3   :  { %v373_v0 = vmul.f32 %v1215_v60, %v372_v62 }
 0x2a5   :  { %v374_v3 = vadd.f32 %v1215_v60, %v373_v0 }
 0x2a7   :  { %v378_v6 = vsel %vm377_vm9, %v1215_v60, %v374_v3 }
 0x2a8   :  { %v1428_v7 = vsel %vm380_vm10, %v382_v5, %v378_v6 }
 0x2a9   :  { %v1432_v8 = vmul.f32 %v1428_v7, %v1334_v4  ;;  %v557_v0 = vsub.f32 1.0, %v1428_v7 }
 0x2ab   :  { %417 = vmatpush.msrb.mxu2 %v1432_v8 }
 0x2ac   :  { %1172 = vmatmul.msk.f32.vlgmr.msrb.gmra.mxu2 %vm78_vm0, %v1322_v1 }
 0x309   :  { %v357_v11 = vpop.f32.mrf.mxu0 }
 0x30a   :  { %v361_v12 = vadd.f32 %v357_v11, %v1437_v9 }
 0x30c   :  { %v1171_v13 = vmul.f32 -1.442695, %v361_v12 }
 0x30e   :  { %1216 = vpow2.f32 %v1171_v13 }
 0x314   :  { %v1217_v14 = vpop.eup %1216 }
 0x315   :  { %v369_v15 = vadd.f32 1.0, %v1217_v14 }
 0x317   :  { %1218 = vrcp.f32 %v369_v15  ;;  %v396_v19 = vand.u32 2147483648, %v369_v15  ;;  %v394_v21 = vand.u32 2147483647, %v369_v15  ;;  %vm390_vm12 = vweird.f32 %v369_v15 }
 0x319   :  { %v397_v23 = vor.u32 1.1754944e-38, %v396_v19  ;;  %vm395_vm14 = vcmp.eq.f32.partialorder %v394_v21, 8.507059e+37 }
 0x31d   :  { %v1219_v16 = vpop.eup %1218 }
 0x31e   :  { %v386_v17 = vmul.f32 %v1219_v16, %v369_v15  ;;  %vm391_vm11 = vweird.f32 %v1219_v16 }
 0x31f   :  { %vm392_vm13 = vmor %vm390_vm12, %vm391_vm11 }
 0x320   :  { %v387_v18 = vsub.f32 1.0, %v386_v17 }
 0x322   :  { %v388_v20 = vmul.f32 %v1219_v16, %v387_v18 }
 0x324   :  { %v389_v22 = vadd.f32 %v1219_v16, %v388_v20 }
 0x326   :  { %v393_v24 = vsel %vm392_vm13, %v1219_v16, %v389_v22 }
 0x327   :  { %v1440_v25 = vsel %vm395_vm14, %v397_v23, %v393_v24  ;;  %v592_v23 = vld [vmem:[%s1795_s7 + $0x58] sm:$0xff]  ;;  %v591_v24 = vld [vmem:[%s1795_s7 + $0x50] sm:$0xff] }
 0x328   :  { %v401_v26 = vmul.f32 %v1440_v25, %v1350_v10  ;;  %v558_v6 = vsub.f32 1.0, %v1440_v25  ;;  %738 = vmatpush.msrb.mxu0 %v592_v23 }
 0x32a   :  { %469 = vmatpush.msra.mxu1 %v401_v26  ;;  %739 = vmatpush.msrb.mxu0 %v591_v24 }
 0x32b   :  { %1174 = vmatmul.msk.f32.vlgmr.msra.gmra.mxu1 %vm78_vm0, %v1322_v1 }
 0x32f   :  { %v419_v27 = vpop.f32.mrf.mxu2 }
 0x330   :  { %445 = vrot.lane.b32.xlu2 %v419_v27, %s1238_s25  ;;  %437 = vmatpush.msra.mxu3 %v419_v27  ;;  %v588_v27 = vld [vmem:[%s1795_s7 + $0x38] sm:$0xff] }
 0x331   :  { %1173 = vmatmul.msk.f32.vlgmr.msra.gmra.mxu3 %vm78_vm0, %v1322_v1 }
 0x332   :  { %516 = vmatpush.msrb.mxu3 %v74_v28  ;;  %v587_v28 = vld [vmem:[%s1795_s7 + $0x30] sm:$0xff] }
 0x334   :  { %517 = vmatpush.msrb.mxu3 %v73_v29  ;;  %v586_v29 = vld [vmem:[%s1795_s7 + $0x28] sm:$0xff] }
 0x336   :  { %518 = vmatpush.msrb.mxu3 %v72_v30  ;;  %v585_v30 = vld [vmem:[%s1795_s7 + $0x20] sm:$0xff] }
 0x338   :  { %519 = vmatpush.msrb.mxu3 %v71_v35  ;;  %v604_v35 = vld [vmem:[%s1796_s8 + $0x58] sm:$0xff] }
 0x33a   :  { %520 = vmatpush.msrb.mxu3 %v70_v36  ;;  %v603_v36 = vld [vmem:[%s1796_s8 + $0x50] sm:$0xff] }
 0x33c   :  { %521 = vmatpush.msrb.mxu3 %v69_v37 }
 0x33e   :  { %522 = vmatpush.msrb.mxu3 %v68_v38  ;;  %v602_v38 = vld [vmem:[%s1796_s8 + $0x48] sm:$0xff] }
 0x340   :  { %523 = vmatpush.msrb.mxu3 %v67_v39  ;;  %v601_v39 = vld [vmem:[%s1796_s8 + $0x40] sm:$0xff] }
 0x342   :  { %524 = vmatpush.msrb.mxu3 %v66_v40  ;;  %v600_v40 = vld [vmem:[%s1796_s8 + $0x38] sm:$0xff] }
 0x344   :  { %525 = vmatpush.msrb.mxu3 %v65_v41  ;;  %v599_v41 = vld [vmem:[%s1796_s8 + $0x30] sm:$0xff] }
 0x346   :  { %526 = vmatpush.msrb.mxu3 %v64_v42 }
 0x348   :  { %527 = vmatpush.msrb.mxu3 %v63_v43 }
 0x34a   :  { %871 = vmatpush.msra.mxu3 %v604_v35 }
 0x34c   :  { %872 = vmatpush.msra.mxu3 %v603_v36 }
 0x34e   :  { %873 = vmatpush.msra.mxu3 %v602_v38 }
 0x350   :  { %874 = vmatpush.msra.mxu3 %v601_v39 }
 0x352   :  { %875 = vmatpush.msra.mxu3 %v600_v40 }
 0x354   :  { %876 = vmatpush.msra.mxu3 %v599_v41 }
 0x38a   :  { %v446_v44 = vpop.permute.xlu2 %445 }
 0x38b   :  { %v452_v45 = vsel %vm274_vm4, %v1432_v8, %v446_v44  ;;  %v598_v44 = vld [vmem:[%s1796_s8 + $0x28] sm:$0xff] }
 0x38c   :  { %877 = vmatpush.msra.mxu3 %v598_v44 }
 0x3a8   :  { %v471_v31 = vpop.f32.mrf.mxu1 }
 0x3a9   :  { %497 = vrot.lane.b32.xlu1 %v471_v31, %s1238_s25  ;;  %489 = vmatpush.msra.mxu2 %v471_v31  ;;  %v584_v31 = vld [vmem:[%s1795_s7 + $0x18] sm:$0xff] }
 0x3aa   :  { %1175 = vmatmul.msk.f32.vlgmr.msra.gmra.mxu2 %vm78_vm0, %v1322_v1 }
 0x3b4   :  { %v439_v32 = vpop.f32.mrf.mxu3 }
 0x3b5   :  { %v442_v33 = vmul.f32 2.0, %v439_v32  ;;  %v583_v32 = vld [vmem:[%s1795_s7 + $0x10] sm:$0xff] }
 0x3b7   :  { %v443_v34 = vsub.f32 %v442_v33, %v1432_v8  ;;  %v582_v33 = vld [vmem:[%s1795_s7 + $0x8] sm:$0xff] }
 0x3b9   :  { %449 = vrot.lane.b32.xlu0 %v443_v34, %s1239_s3  ;;  %v581_v34 = vld [vmem:[%s1795_s7] sm:$0xff] }
 0x41b   :  { %v498_v52 = vpop.permute.xlu1 %497 }
 0x41c   :  { %v504_v53 = vsel %vm274_vm4, %v401_v26, %v498_v52 }
 0x42b   :  { %v450_v46 = vpop.permute.xlu0 %449 }
 0x42c   :  { %v453_v47 = vsel %vm276_vm5, %v452_v45, %v450_v46  ;;  %v597_v46 = vld [vmem:[%s1796_s8 + $0x20] sm:$0xff] }
 0x42d   :  { %v491_v48 = vpop.f32.mrf.mxu2  ;;  %1176 = vmatmul.msk.f32.vlgmr.msrb.gmra.mxu3 %vm330_vm6, %v453_v47  ;;  %v596_v47 = vld [vmem:[%s1796_s8 + $0x18] sm:$0xff] }
 0x42e   :  { %v494_v49 = vmul.f32 2.0, %v491_v48  ;;  %878 = vmatpush.msra.mxu3 %v597_v46 }
 0x430   :  { %v495_v50 = vsub.f32 %v494_v49, %v401_v26  ;;  %v589_v26 = vld [vmem:[%s1795_s7 + $0x40] sm:$0xff]  ;;  %v595_v49 = vld [vmem:[%s1796_s8 + $0x10] sm:$0xff]  ;;  %879 = vmatpush.msra.mxu3 %v596_v47 }
 0x432   :  { %501 = vrot.lane.b32.xlu2 %v495_v50, %s1239_s3  ;;  %880 = vmatpush.msra.mxu3 %v595_v49 }
 0x43a   :  { %549 = vrot.lane.b32.xlu2 %v1334_v4, %s1238_s25 }
 0x48c   :  { %v502_v54 = vpop.permute.xlu2 %501 }
 0x48d   :  { %v505_v55 = vsel %vm276_vm5, %v504_v53, %v502_v54  ;;  %v594_v53 = vld [vmem:[%s1796_s8 + $0x8] sm:$0xff] }
 0x48e   :  { %1177 = vmatmul.msk.f32.gmra.mxu3 %vm330_vm6, %v505_v55 }
 0x48f   :  { %881 = vmatpush.msra.mxu3 %v594_v53  ;;  %v614_v53 = vld [vmem:[%s1798_s9 + $0x48] sm:$0xff] }
 0x494   :  { %v550_v63 = vpop.permute.xlu2 %549 }
 0x4b0   :  { %v529_v56 = vpop.f32.mrf.mxu3 }
 0x4b1   :  { %537 = vrot.lane.b32.xlu0 %v529_v56, %s1239_s3 }
 0x511   :  { %v532_v57 = vpop.f32.mrf.mxu3 }
 0x512   :  { %539 = vrot.lane.b32.xlu1 %v532_v57, %s1239_s3 }
 0x51a   :  { %551 = vrot.lane.b32.xlu1 %v1350_v10, %s1238_s25  ;;  %v555_v10 = vmul.f32 %v550_v63, %v1428_v7 }
 0x523   :  { %v538_v58 = vpop.permute.xlu0 %537 }
 0x524   :  { %v543_v4 = vadd.f32 %v538_v58, %v1421_v51 }
 0x526   :  { %1220 = vtanh.f32 %v543_v4 }
 0x52c   :  { %v1221_v59 = vpop.eup %1220 }
 0x52d   :  { %561 = vrot.lane.b32.xlu0 %v1221_v59, %s1240_s5 }
 0x584   :  { %v540_v60 = vpop.permute.xlu1 %539 }
 0x585   :  { %v544_v61 = vadd.f32 %v540_v60, %v1437_v9  ;;  %v593_v60 = vld [vmem:[%s1796_s8] sm:$0xff] }
 0x586   :  { %882 = vmatpush.msra.mxu3 %v593_v60  ;;  %v608_v60 = vld [vmem:[%s1798_s9 + $0x18] sm:$0xff] }
 0x587   :  { %1222 = vtanh.f32 %v544_v61 }
 0x58c   :  { %v552_v5 = vpop.permute.xlu1 %551 }
 0x58d   :  { %v1223_v62 = vpop.eup %1222  ;;  %v556_v9 = vmul.f32 %v552_v5, %v1440_v25  ;;  %v590_v25 = vld [vmem:[%s1795_s7 + $0x48] sm:$0xff] }
 0x58e   :  { %563 = vrot.lane.b32.xlu2 %v1223_v62, %s1240_s5  ;;  %740 = vmatpush.msrb.mxu0 %v590_v25 }
 0x590   :  { %741 = vmatpush.msrb.mxu0 %v589_v26 }
 0x592   :  { %742 = vmatpush.msrb.mxu0 %v588_v27 }
 0x594   :  { %743 = vmatpush.msrb.mxu0 %v587_v28 }
 0x596   :  { %744 = vmatpush.msrb.mxu0 %v586_v29 }
 0x598   :  { %745 = vmatpush.msrb.mxu0 %v585_v30 }
 0x59a   :  { %746 = vmatpush.msrb.mxu0 %v584_v31 }
 0x59c   :  { %747 = vmatpush.msrb.mxu0 %v583_v32 }
 0x59e   :  { %748 = vmatpush.msrb.mxu0 %v582_v33 }
 0x59f   :  { %v562_v2 = vpop.permute.xlu0 %561 }
 0x5a0   :  { %v567_v3 = vmul.f32 %v562_v2, %v557_v0  ;;  %749 = vmatpush.msrb.mxu0 %v581_v34 }
 0x5a2   :  { %v569_v51 = vadd.f32 %v567_v3, %v555_v10 }
 0x5a4   :  { %573 = vrot.lane.b32.xlu0 %v569_v51, %s1240_s5 }
 0x5e8   :  { %v564_v8 = vpop.permute.xlu2 %563 }
 0x5e9   :  { %v568_v11 = vmul.f32 %v564_v8, %v558_v6 }
 0x5eb   :  { %v570_v12 = vadd.f32 %v568_v11, %v556_v9  ;;  %v1210_v9 = vld [vmem:[%s1797_s10] ss:$0 sm:$0xff] }
 0x5ed   :  { %575 = vrot.lane.b32.xlu1 %v570_v12, %s1240_s5 }
 0x616   :  { %v1514_v13 = vpop.permute.xlu0 %573 }
 0x617   :  { %579 = vst.msk [vmem:[%s1794_s13] sm:$0xff] %vm274_vm4, %v1514_v13  ;;  %636 = vmatpush.msrb.mxu1 %v1514_v13 }
 0x618   :  { %1180 = vmatmul.msk.f32.vlgmr.msrb.gmra.mxu1 %vm78_vm0, %v1322_v1 }
 0x61e   :  { %v1529_v14 = vld [vmem:[%s1789_s2 + $0x10] sm:$0xff] }
 0x65f   :  { %v1524_v7 = vpop.permute.xlu1 %575 }
 0x660   :  { %580 = vst.msk [vmem:[%s1794_s13 + $0x8] sm:$0xff] %vm274_vm4, %v1524_v7  ;;  %688 = vmatpush.msra.mxu1 %v1524_v7 }
 0x661   :  { %1182 = vmatmul.msk.f32.vlgmr.msra.gmra.mxu1 %vm78_vm0, %v1322_v1 }
 0x662   :  { %772 = vmatpush.msrb.mxu1 %v1529_v14 }
 0x667   :  { %v1540_v15 = vld [vmem:[%s1789_s2 + $0x18] sm:$0xff] }
 0x668   :  { %824 = vmatpush.msra.mxu1 %v1540_v15 }
 0x669   :  { %1186 = vmatmul.msk.f32.vlgmr.msrb.gmra.mxu1 %vm78_vm0, %v1322_v1 }
 0x671   :  { %1188 = vmatmul.msk.f32.vlgmr.msra.gmra.mxu1 %vm78_vm0, %v1322_v1 }
 0x695   :  { %v638_v16 = vpop.f32.mrf.mxu1 }
 0x696   :  { %656 = vmatpush.msrb.mxu2 %v638_v16  ;;  %664 = vrot.lane.b32.xlu1 %v638_v16, %s1238_s25 }
 0x697   :  { %1181 = vmatmul.msk.f32.vlgmr.msrb.gmra.mxu2 %vm78_vm0, %v1322_v1 }
 0x6de   :  { %v690_v17 = vpop.f32.mrf.mxu1 }
 0x6df   :  { %708 = vmatpush.msra.mxu2 %v690_v17 }
 0x6e0   :  { %1183 = vmatmul.msk.f32.vlgmr.msra.gmra.mxu2 %vm78_vm0, %v1322_v1 }
 0x6e6   :  { %v774_v18 = vpop.f32.mrf.mxu1 }
 0x6e7   :  { %800 = vrot.lane.b32.xlu2 %v774_v18, %s1238_s25  ;;  %792 = vmatpush.msrb.mxu2 %v774_v18 }
 0x6e8   :  { %1187 = vmatmul.msk.f32.vlgmr.msrb.gmra.mxu2 %vm78_vm0, %v1322_v1 }
 0x6ee   :  { %v1558_v19 = vpop.f32.mrf.mxu1 }
 0x6ef   :  { %844 = vmatpush.msra.mxu2 %v1558_v19 }
 0x6f0   :  { %1189 = vmatmul.msk.f32.vlgmr.msra.gmra.mxu2 %vm78_vm0, %v1322_v1 }
 0x708   :  { %v665_v54 = vpop.permute.xlu1 %664 }
 0x709   :  { %v671_v56 = vsel %vm274_vm4, %v1514_v13, %v665_v54  ;;  %v613_v54 = vld [vmem:[%s1798_s9 + $0x40] sm:$0xff] }
 0x71a   :  { %v658_v20 = vpop.f32.mrf.mxu2 }
 0x71b   :  { %v661_v21 = vmul.f32 2.0, %v658_v20 }
 0x71d   :  { %v662_v22 = vsub.f32 %v661_v21, %v1514_v13 }
 0x71f   :  { %668 = vrot.lane.b32.xlu2 %v662_v22, %s1239_s3 }
 0x727   :  { %716 = vrot.lane.b32.xlu2 %v690_v17, %s1238_s25 }
 0x741   :  { %v801_v48 = vpop.permute.xlu2 %800 }
 0x742   :  { %v807_v61 = vsel %vm274_vm4, %v1529_v14, %v801_v48 }
 0x763   :  { %v710_v37 = vpop.f32.mrf.mxu2 }
 0x764   :  { %v713_v58 = vmul.f32 2.0, %v710_v37 }
 0x766   :  { %v714_v59 = vsub.f32 %v713_v58, %v1524_v7 }
 0x76b   :  { %v794_v42 = vpop.f32.mrf.mxu2 }
 0x76c   :  { %v797_v43 = vmul.f32 2.0, %v794_v42 }
 0x76e   :  { %v798_v45 = vsub.f32 %v797_v43, %v1529_v14 }
 0x770   :  { %804 = vrot.lane.b32.xlu0 %v798_v45, %s1239_s3 }
 0x773   :  { %v846_v50 = vpop.f32.mrf.mxu2 }
 0x774   :  { %v849_v52 = vmul.f32 2.0, %v846_v50  ;;  %v616_v50 = vld [vmem:[%s1798_s9 + $0x58] sm:$0xff] }
 0x776   :  { %v850_v55 = vsub.f32 %v849_v52, %v1540_v15  ;;  %v615_v52 = vld [vmem:[%s1798_s9 + $0x50] sm:$0xff] }
 0x778   :  { %852 = vrot.lane.b32.xlu0 %v1558_v19, %s1238_s25  ;;  %856 = vrot.lane.b32.xlu1 %v850_v55, %s1239_s3 }
 0x779   :  { %v669_v57 = vpop.permute.xlu2 %668 }
 0x77a   :  { %v672_v4 = vsel %vm276_vm5, %v671_v56, %v669_v57  ;;  %v611_v57 = vld [vmem:[%s1798_s9 + $0x30] sm:$0xff] }
 0x77b   :  { %1184 = vmatmul.msk.f32.vlgmr.msrb.gmra.mxu0 %vm330_vm6, %v672_v4  ;;  %v610_v4 = vld [vmem:[%s1798_s9 + $0x28] sm:$0xff] }
 0x780   :  { %720 = vrot.lane.b32.xlu0 %v714_v59, %s1239_s3  ;;  %v609_v59 = vld [vmem:[%s1798_s9 + $0x20] sm:$0xff] }
 0x781   :  { %v717_v51 = vpop.permute.xlu2 %716 }
 0x782   :  { %v723_v5 = vsel %vm274_vm4, %v1524_v7, %v717_v51 }
 0x7e2   :  { %v805_v62 = vpop.permute.xlu0 %804 }
 0x7e3   :  { %v808_v63 = vsel %vm276_vm5, %v807_v61, %v805_v62  ;;  %v607_v61 = vld [vmem:[%s1798_s9 + $0x10] sm:$0xff]  ;;  %v606_v62 = vld [vmem:[%s1798_s9 + $0x8] sm:$0xff] }
 0x7e4   :  { %1190 = vmatmul.msk.f32.vlgmr.msra.gmra.mxu3 %vm330_vm6, %v808_v63 }
 0x7ea   :  { %v853_v0 = vpop.permute.xlu0 %852  ;;  %v857_v2 = vpop.permute.xlu1 %856 }
 0x7eb   :  { %v859_v10 = vsel %vm274_vm4, %v1540_v15, %v853_v0 }
 0x7ec   :  { %v860_v3 = vsel %vm276_vm5, %v859_v10, %v857_v2  ;;  %v605_v10 = vld [vmem:[%s1798_s9] sm:$0xff] }
 0x7ed   :  { %1191 = vmatmul.msk.f32.gmra.mxu3 %vm330_vm6, %v860_v3 }
 0x7f2   :  { %v721_v6 = vpop.permute.xlu0 %720 }
 0x7f3   :  { %v724_v8 = vsel %vm276_vm5, %v723_v5, %v721_v6 }
 0x7f4   :  { %1185 = vmatmul.msk.f32.gmra.mxu0 %vm330_vm6, %v724_v8 }
 0x7f8   :  { %v751_v11 = vpop.f32.mrf.mxu0 }
 0x7f9   :  { %v1665_v12 = vadd.f32 %v1210_v9, %v751_v11 }
 0x867   :  { %v884_v13 = vpop.f32.mrf.mxu3 }
 0x868   :  { %v890_v16 = vadd.f32 %v884_v13, %v1665_v12 }
 0x86a   :  { %v1192_v17 = vmul.f32 -1.442695, %v890_v16 }
 0x86c   :  { %1224 = vpow2.f32 %v1192_v17 }
 0x870   :  { %v887_v21 = vpop.f32.mrf.mxu3 }
 0x871   :  { %v754_v18 = vpop.f32.mrf.mxu0 }
 0x872   :  { %v1225_v19 = vpop.eup %1224  ;;  %v1668_v7 = vadd.f32 %v1210_v9, %v754_v18 }
 0x873   :  { %v898_v20 = vadd.f32 1.0, %v1225_v19 }
 0x874   :  { %v891_v22 = vadd.f32 %v887_v21, %v1668_v7 }
 0x875   :  { %1226 = vrcp.f32 %v898_v20  ;;  %v911_v29 = vand.u32 2147483648, %v898_v20  ;;  %v909_v31 = vand.u32 2147483647, %v898_v20  ;;  %vm905_vm1 = vweird.f32 %v898_v20 }
 0x876   :  { %v1193_v23 = vmul.f32 -1.442695, %v891_v22 }
 0x877   :  { %v912_v33 = vor.u32 1.1754944e-38, %v911_v29  ;;  %vm910_vm7 = vcmp.eq.f32.partialorder %v909_v31, 8.507059e+37  ;;  %v1112_v29 = vld [vmem:[%s1799_s11] sm:$0xff] }
 0x878   :  { %1228 = vpow2.f32 %v1193_v23 }
 0x87b   :  { %v1227_v24 = vpop.eup %1226 }
 0x87c   :  { %v901_v25 = vmul.f32 %v1227_v24, %v898_v20  ;;  %vm906_vm15 = vweird.f32 %v1227_v24 }
 0x87d   :  { %vm907_vm3 = vmor %vm905_vm1, %vm906_vm15 }
 0x87e   :  { %v1229_v26 = vpop.eup %1228  ;;  %v902_v27 = vsub.f32 1.0, %v901_v25 }
 0x87f   :  { %v899_v28 = vadd.f32 1.0, %v1229_v26 }
 0x880   :  { %v903_v30 = vmul.f32 %v1227_v24, %v902_v27 }
 0x881   :  { %1230 = vrcp.f32 %v899_v28  ;;  %v926_v40 = vand.u32 2147483648, %v899_v28  ;;  %v924_v42 = vand.u32 2147483647, %v899_v28  ;;  %vm920_vm9 = vweird.f32 %v899_v28 }
 0x882   :  { %v904_v32 = vadd.f32 %v1227_v24, %v903_v30 }
 0x883   :  { %v927_v44 = vor.u32 1.1754944e-38, %v926_v40  ;;  %vm925_vm11 = vcmp.eq.f32.partialorder %v924_v42, 8.507059e+37 }
 0x884   :  { %v908_v34 = vsel %vm907_vm3, %v1227_v24, %v904_v32 }
 0x885   :  { %v1671_v35 = vsel %vm910_vm7, %v912_v33, %v908_v34 }
 0x886   :  { %v1675_v36 = vmul.f32 %v1529_v14, %v1671_v35  ;;  %v1087_v24 = vsub.f32 1.0, %v1671_v35 }
 0x887   :  { %v1231_v37 = vpop.eup %1230 }
 0x888   :  { %v916_v38 = vmul.f32 %v1231_v37, %v899_v28  ;;  %947 = vmatpush.msrb.mxu1 %v1675_v36  ;;  %vm921_vm8 = vweird.f32 %v1231_v37  ;;  %v1113_v28 = vld [vmem:[%s1799_s11 + $0x8] sm:$0xff] }
 0x889   :  { %1194 = vmatmul.msk.f32.vlgmr.msrb.gmra.mxu1 %vm78_vm0, %v1322_v1  ;;  %vm922_vm10 = vmor %vm920_vm9, %vm921_vm8 }
 0x88a   :  { %v917_v39 = vsub.f32 1.0, %v916_v38  ;;  %v1211_v38 = vld [vmem:[%s1800_s12] ss:$0 sm:$0xff] }
 0x88c   :  { %v918_v41 = vmul.f32 %v1231_v37, %v917_v39 }
 0x88e   :  { %v919_v43 = vadd.f32 %v1231_v37, %v918_v41 }
 0x890   :  { %v923_v45 = vsel %vm922_vm10, %v1231_v37, %v919_v43 }
 0x891   :  { %v1680_v46 = vsel %vm925_vm11, %v927_v44, %v923_v45 }
 0x892   :  { %v931_v47 = vmul.f32 %v1540_v15, %v1680_v46  ;;  %v1088_v31 = vsub.f32 1.0, %v1680_v46 }
 0x894   :  { %999 = vmatpush.msrb.mxu3 %v931_v47 }
 0x895   :  { %1196 = vmatmul.msk.f32.vlgmr.msrb.gmra.mxu3 %vm78_vm0, %v1322_v1 }
 0x906   :  { %v949_v48 = vpop.f32.mrf.mxu1 }
 0x907   :  { %975 = vrot.lane.b32.xlu1 %v949_v48, %s1238_s25  ;;  %967 = vmatpush.msrb.mxu2 %v949_v48 }
 0x908   :  { %1195 = vmatmul.msk.f32.vlgmr.msrb.gmra.mxu2 %vm78_vm0, %v1322_v1 }
 0x909   :  { %1046 = vmatpush.msra.mxu2 %v616_v50 }
 0x90b   :  { %1047 = vmatpush.msra.mxu2 %v615_v52 }
 0x90d   :  { %1048 = vmatpush.msra.mxu2 %v614_v53 }
 0x90f   :  { %1049 = vmatpush.msra.mxu2 %v613_v54 }
 0x918   :  { %v1001_v49 = vpop.f32.mrf.mxu3 }
 0x919   :  { %1027 = vrot.lane.b32.xlu0 %v1001_v49, %s1238_s25  ;;  %1019 = vmatpush.msra.mxu1 %v1001_v49 }
 0x91a   :  { %1197 = vmatmul.msk.f32.vlgmr.msra.gmra.mxu1 %vm78_vm0, %v1322_v1  ;;  %v612_v1 = vld [vmem:[%s1798_s9 + $0x38] sm:$0xff] }
 0x91b   :  { %1050 = vmatpush.msra.mxu2 %v612_v1 }
 0x91d   :  { %1051 = vmatpush.msra.mxu2 %v611_v57 }
 0x91f   :  { %1052 = vmatpush.msra.mxu2 %v610_v4 }
 0x921   :  { %1053 = vmatpush.msra.mxu2 %v609_v59 }
 0x923   :  { %1054 = vmatpush.msra.mxu2 %v608_v60 }
 0x925   :  { %1055 = vmatpush.msra.mxu2 %v607_v61 }
 0x927   :  { %1056 = vmatpush.msra.mxu2 %v606_v62 }
 0x929   :  { %1057 = vmatpush.msra.mxu2 %v605_v10 }
 0x979   :  { %v976_v3 = vpop.permute.xlu1 %975 }
 0x97a   :  { %v982_v51 = vsel %vm274_vm4, %v1675_v36, %v976_v3 }
 0x98b   :  { %v969_v55 = vpop.f32.mrf.mxu2  ;;  %v1028_v8 = vpop.permute.xlu0 %1027 }
 0x98c   :  { %v972_v56 = vmul.f32 2.0, %v969_v55  ;;  %v1034_v9 = vsel %vm274_vm4, %v931_v47, %v1028_v8 }
 0x98e   :  { %v973_v58 = vsub.f32 %v972_v56, %v1675_v36 }
 0x990   :  { %979 = vrot.lane.b32.xlu2 %v973_v58, %s1239_s3 }
 0x997   :  { %v1021_v63 = vpop.f32.mrf.mxu1 }
 0x998   :  { %v1024_v0 = vmul.f32 2.0, %v1021_v63 }
 0x99a   :  { %v1025_v2 = vsub.f32 %v1024_v0, %v931_v47 }
 0x99c   :  { %1031 = vrot.lane.b32.xlu1 %v1025_v2, %s1239_s3 }
 0x9a4   :  { %1079 = vrot.lane.b32.xlu1 %v1529_v14, %s1238_s25 }
 0x9ea   :  { %v980_v5 = vpop.permute.xlu2 %979 }
 0x9eb   :  { %v983_v6 = vsel %vm276_vm5, %v982_v51, %v980_v5 }
 0x9ec   :  { %1198 = vmatmul.msk.f32.vlgmr.msra.gmra.mxu2 %vm330_vm6, %v983_v6 }
 0xa0e   :  { %v1032_v11 = vpop.permute.xlu1 %1031 }
 0xa0f   :  { %v1035_v14 = vsel %vm276_vm5, %v1034_v9, %v1032_v11 }
 0xa10   :  { %1199 = vmatmul.msk.f32.gmra.mxu2 %vm330_vm6, %v1035_v14 }
 0xa16   :  { %v1080_v23 = vpop.permute.xlu1 %1079 }
 0xa6f   :  { %v1059_v13 = vpop.f32.mrf.mxu2 }
 0xa70   :  { %1067 = vrot.lane.b32.xlu2 %v1059_v13, %s1239_s3 }
 0xa93   :  { %v1062_v16 = vpop.f32.mrf.mxu2 }
 0xa94   :  { %1069 = vrot.lane.b32.xlu0 %v1062_v16, %s1239_s3 }
 0xa9c   :  { %1081 = vrot.lane.b32.xlu0 %v1540_v15, %s1238_s25  ;;  %v1085_v15 = vmul.f32 %v1080_v23, %v1671_v35 }
 0xaca   :  { %v1068_v17 = vpop.permute.xlu2 %1067 }
 0xacb   :  { %v1073_v18 = vadd.f32 %v1068_v17, %v1665_v12  ;;  %v1115_v12 = vld [vmem:[%s1799_s11 + $0x18] sm:$0xff] }
 0xacc   :  { %1136 = vmatpush.msra.mxu0 %v1115_v12 }
 0xacd   :  { %1232 = vtanh.f32 %v1073_v18 }
 0xad3   :  { %v1233_v19 = vpop.eup %1232 }
 0xad4   :  { %1091 = vrot.lane.b32.xlu2 %v1233_v19, %s1240_s5 }
 0xb06   :  { %v1070_v20 = vpop.permute.xlu0 %1069 }
 0xb07   :  { %v1074_v21 = vadd.f32 %v1070_v20, %v1668_v7  ;;  %v1114_v7 = vld [vmem:[%s1799_s11 + $0x10] sm:$0xff] }
 0xb08   :  { %1137 = vmatpush.msra.mxu0 %v1114_v7 }
 0xb09   :  { %1234 = vtanh.f32 %v1074_v21 }
 0xb0a   :  { %1138 = vmatpush.msra.mxu0 %v1113_v28 }
 0xb0c   :  { %1139 = vmatpush.msra.mxu0 %v1112_v29 }
 0xb0e   :  { %v1082_v30 = vpop.permute.xlu0 %1081 }
 0xb0f   :  { %v1235_v22 = vpop.eup %1234  ;;  %v1086_v33 = vmul.f32 %v1082_v30, %v1680_v46 }
 0xb10   :  { %1093 = vrot.lane.b32.xlu1 %v1235_v22, %s1240_s5 }
 0xb2e   :  { %v1092_v25 = vpop.permute.xlu2 %1091 }
 0xb2f   :  { %v1097_v26 = vmul.f32 %v1092_v25, %v1087_v24 }
 0xb31   :  { %v1099_v27 = vadd.f32 %v1097_v26, %v1085_v15 }
 0xb33   :  { %1103 = vrot.lane.b32.xlu2 %v1099_v27, %s1240_s5 }
 0xb82   :  { %v1094_v32 = vpop.permute.xlu1 %1093 }
 0xb83   :  { %v1098_v34 = vmul.f32 %v1094_v32, %v1088_v31 }
 0xb85   :  { %v1100_v35 = vadd.f32 %v1098_v34, %v1086_v33 }
 0xb87   :  { %1105 = vrot.lane.b32.xlu0 %v1100_v35, %s1240_s5 }
 0xb8d   :  { %v1104_v36 = vpop.permute.xlu2 %1103 }
 0xb8e   :  { %1200 = vst.msk [vmem:[%s1794_s13 + $0x10] sm:$0xff] %vm274_vm4, %v1104_v36  ;;  %1202 = vmatmul.msk.f32.vlgmr.msra.gmra.mxu0 %vm274_vm4, %v1104_v36 }
 0xbf9   :  { %v1106_v37 = vpop.permute.xlu0 %1105 }
 0xbfa   :  { %1201 = vst.msk [vmem:[%s1794_s13 + $0x18] sm:$0xff] %vm274_vm4, %v1106_v37  ;;  %1203 = vmatmul.msk.f32.gmra.mxu0 %vm274_vm4, %v1106_v37 }
 0xc0b   :  { %v1141_v39 = vpop.f32.mrf.mxu0 }
 0xc0c   :  { %v1142_v40 = vadd.f32 %v1211_v38, %v1141_v39 }
 0xc0e   :  { %1147 = vst.msk [vmem:[%s1801_s14] sm:$0xff] %vm132_vm2, %v1142_v40 }
 0xc77   :  { %v1144_v41 = vpop.f32.mrf.mxu0 }
 0xc78   :  { %v1145_v42 = vadd.f32 %v1211_v38, %v1144_v41 }
 0xc7a   :  { %1148 = vst.msk [vmem:[%s1801_s14 + $0x8] sm:$0xff] %vm132_vm2, %v1145_v42 }

</bundles_post_ra>
